<compile_context>
chip_gen: v7x
topology: tpu7x:2x2x1
jax: 0.10.0
libtpu: 0.0.40
codegen_flags: <defaults>
</compile_context>

<pallas_src>
import math

import jax
import jax.numpy as jnp
from jax.experimental import pallas as pl
from jax.experimental.pallas import tpu as pltpu

EPS = 1e-5  # nn.LayerNorm default eps


# ----------------------------------------------------------------------------
# Shared f32 LayerNorm (used by kernel and reference).
# ----------------------------------------------------------------------------
def _layer_norm(v, gamma, beta):
    mu = jnp.mean(v, axis=-1, keepdims=True)
    c = v - mu
    var = jnp.mean(c * c, axis=-1, keepdims=True)
    return c * jax.lax.rsqrt(var + EPS) * gamma + beta


# ----------------------------------------------------------------------------
# In-kernel batched single-head attention (bf16 MXU matmuls, f32 softmax).
# ----------------------------------------------------------------------------
def _softmax_attention(q, k, v, scale):
    s = jnp.einsum("bqd,bkd->bqk", q.astype(jnp.bfloat16), k.astype(jnp.bfloat16),
                   preferred_element_type=jnp.float32) * scale
    m = jnp.max(s, axis=-1, keepdims=True)
    p = jnp.exp(s - m)
    p = p * pl.reciprocal(jnp.sum(p, axis=-1, keepdims=True), approx=True)
    return jnp.einsum("bqk,bkd->bqd", p.astype(jnp.bfloat16), v.astype(jnp.bfloat16),
                      preferred_element_type=jnp.float32)


# ----------------------------------------------------------------------------
# Pallas kernel: one grid step == a tile of BT batch elements.
# ----------------------------------------------------------------------------
def _decoder_layer_kernel(
    x_ref, cr_ref,
    sel1_ref, wq1_ref, wk1_ref, wv1_ref, wo1_ref, g1_ref, be1_ref,
    sel2_ref, wq2_ref, wk2_ref, wv2_ref, wo2_ref, g2_ref, be2_ref,
    wA_ref, wC_ref, wB_ref, b1_ref, wc2_ref, bc2_ref, g3_ref, be3_ref,
    out_ref,
):
    BT, L, D = x_ref.shape
    S = cr_ref.shape[1]
    D2, D4 = D // 2, D // 4

    def mm(a, w_ref):
        # Weight ref read at its use site (keeps live ranges short); bf16
        # operands, f32 accumulation on the MXU.
        return jnp.dot(a.astype(jnp.bfloat16), w_ref[...],
                       preferred_element_type=jnp.float32)

    x = x_ref[...]                          # (BT, L, D) f32
    x2d = x.reshape(BT * L, D)              # rows = (batch, seq); lanes = D
    xb = x2d.astype(jnp.bfloat16)

    # ---- stream 1: x1_1 = x[..., D2:], self-attention + LayerNorm(D/2) ------
    x1_1 = mm(xb, sel1_ref)                 # selector matmul == lane split
    q1 = mm(x1_1, wq1_ref).reshape(BT, L, D2)
    k1 = mm(x1_1, wk1_ref).reshape(BT, L, D2)
    v1 = mm(x1_1, wv1_ref).reshape(BT, L, D2)
    a1 = _softmax_attention(q1, k1, v1, 1.0 / math.sqrt(D2))
    a1 = mm(a1.reshape(BT * L, D2), wo1_ref)
    x1n = _layer_norm(x1_1 + a1, g1_ref[...], be1_ref[...])          # (BT*L, D2)

    # ---- stream 2: x2_1 = x1n[..., D4:], cross-attention + LayerNorm(D/4) ---
    x2_1 = mm(x1n, sel2_ref)
    q2 = mm(x2_1, wq2_ref).reshape(BT, L, D4)
    cr2d = cr_ref[...].reshape(BT * S, D).astype(jnp.bfloat16)
    k2 = mm(cr2d, wk2_ref).reshape(BT, S, D4)
    v2 = mm(cr2d, wv2_ref).reshape(BT, S, D4)
    a2 = _softmax_attention(q2, k2, v2, 1.0 / math.sqrt(D4))
    a2 = mm(a2.reshape(BT * L, D4), wo2_ref)
    x2n = _layer_norm(x2_1 + a2, g2_ref[...], be2_ref[...])          # (BT*L, D4)

    # ---- FFN with block-partitioned conv1 (ODE blocks + concat pre-folded) --
    h = mm(xb, wA_ref) + mm(x1n, wC_ref) + mm(x2n, wB_ref) + b1_ref[...]
    h = jnp.maximum(h, 0.0)
    y = mm(h, wc2_ref) + bc2_ref[...]

    out = _layer_norm(x2d + y, g3_ref[...], be3_ref[...])
    out_ref[...] = out.reshape(BT, L, D).astype(out_ref.dtype)


def decoder_layer1_pallas(x, cross, kernel_params, *, block_b=None):
    B, L, D = x.shape
    S = cross.shape[1]

    if block_b is None:
        # Prefer >= 2 grid steps (keeps both v7x TensorCores busy) with several
        # batch elements per step to amortize the ~0.35us per-step overhead.
        block_b = B
        for cand in (8, 4, 2, 1):
            if B % cand == 0 and B // cand >= 2:
                block_b = cand
                break
    assert B % block_b == 0, (B, block_b)
    grid = (B // block_b,)

    x_spec = pl.BlockSpec((block_b, L, D), lambda b: (b, 0, 0))
    cr_spec = pl.BlockSpec((block_b, S, D), lambda b: (b, 0, 0))
    out_spec = pl.BlockSpec((block_b, L, D), lambda b: (b, 0, 0))
    # Constant weights: full-array blocks, same index every step.
    # TODO(synk): single-buffer these constants (pipeline_mode=pl.Buffered(1))
    #             and add an L/S tile axis for production-length sequences so
    #             the FFN/score intermediates stay inside v7x's 64 MiB VMEM.
    w_specs = [pl.BlockSpec(p.shape, lambda b: (0, 0)) for p in kernel_params]

    return pl.pallas_call(
        _decoder_layer_kernel,
        out_shape=jax.ShapeDtypeStruct((B, L, D), x.dtype),
        grid_spec=pltpu.PrefetchScalarGridSpec(
            num_scalar_prefetch=0,
            grid=grid,
            in_specs=[x_spec, cr_spec] + w_specs,
            out_specs=out_spec,
        ),
        compiler_params=pltpu.CompilerParams(
            dimension_semantics=("parallel",),
            vmem_limit_bytes=32 * 1024 * 1024,
        ),
    )(x, cross, *kernel_params)


# ----------------------------------------------------------------------------
# Host-side weight preparation: fold splits / ODE blocks / concat into weights.
# ----------------------------------------------------------------------------
def prepare_kernel_params(params, matmul_dtype=jnp.bfloat16):
    (w_ode1, b_ode1, wq1, wk1, wv1, wo1, g1, be1,
     w_ode2, b_ode2, wq2, wk2, wv2, wo2, g2, be2,
     w_c1, b_c1, w_c2, b_c2, g3, be3) = params

    D2 = w_ode1.shape[0]
    D, D4 = 2 * D2, D2 // 2
    d_ff = w_c1.shape[1]
    f32 = jnp.float32

    # Selector matmuls replacing the lane-axis torch.split's.
    sel1 = jnp.zeros((D, D2), f32).at[D2:, :].set(jnp.eye(D2, dtype=f32))
    sel2 = jnp.zeros((D2, D4), f32).at[D4:, :].set(jnp.eye(D4, dtype=f32))

    # Row partition of conv1 matching torch.cat((x3_C, x2_1, x2_2), dim=2).
    w_c1_a = w_c1[:D2]
    w_c1_b = w_c1[D2:D2 + D4]
    w_c1_c = w_c1[D2 + D4:]

    # x3_C @ w_c1_a == x @ wA + b_ode1 @ w_c1_a      (ODE block 1 folded)
    wA = jnp.zeros((D, d_ff), f32).at[:D2].set((jnp.eye(D2, dtype=f32) + w_ode1) @ w_c1_a)
    # x2_2' @ w_c1_c == x1n @ wC + b_ode2 @ w_c1_c   (ODE block 2 folded)
    wC = jnp.zeros((D2, d_ff), f32).at[:D4].set((jnp.eye(D4, dtype=f32) + w_ode2) @ w_c1_c)
    b1 = b_c1 + b_ode1 @ w_c1_a + b_ode2 @ w_c1_c

    c = lambda w: w.astype(matmul_dtype)
    return [
        c(sel1), c(wq1), c(wk1), c(wv1), c(wo1), g1, be1,
        c(sel2), c(wq2), c(wk2), c(wv2), c(wo2), g2, be2,
        c(wA), c(wC), c(w_c1_b), b1, c(w_c2), b_c2, g3, be3,
    ]


# ----------------------------------------------------------------------------
# Faithful pure-JAX reference (mirrors the PyTorch split/concat structure).
# ----------------------------------------------------------------------------
def _attention_ref(q, k, v):
    s = jnp.dot(q, k.T) / math.sqrt(q.shape[-1])
    p = jax.nn.softmax(s, axis=-1)
    return jnp.dot(p, v)


def _forward_single_ref(x, cr, params):
    (w_ode1, b_ode1, wq1, wk1, wv1, wo1, g1, be1,
     w_ode2, b_ode2, wq2, wk2, wv2, wo2, g2, be2,
     w_c1, b_c1, w_c2, b_c2, g3, be3) = params
    D = x.shape[-1]
    D2, D4 = D // 2, D // 4

    x1_2, x1_1 = x[:, :D2], x[:, D2:]
    x3_C = x1_2 + (x1_2 @ w_ode1 + b_ode1)                       # ODE block 1

    a1 = _attention_ref(x1_1 @ wq1, x1_1 @ wk1, x1_1 @ wv1) @ wo1
    x1_1 = _layer_norm(x1_1 + a1, g1, be1)

    x2_2, x2_1 = x1_1[:, :D4], x1_1[:, D4:]
    x2_2 = x2_2 + (x2_2 @ w_ode2 + b_ode2)                       # ODE block 2
    a2 = _attention_ref(x2_1 @ wq2, cr @ wk2, cr @ wv2) @ wo2
    x2_1 = _layer_norm(x2_1 + a2, g2, be2)

    x3 = jnp.concatenate([x3_C, x2_1, x2_2], axis=-1)
    y = jnp.maximum(x3 @ w_c1 + b_c1, 0.0) @ w_c2 + b_c2
    return _layer_norm(x + y, g3, be3)


# ----------------------------------------------------------------------------
# Deterministic parameter construction (synthetic, no checkpoint load).
# ----------------------------------------------------------------------------
def init_params(key, d_model, d_ff):
    D, D2, D4 = d_model, d_model // 2, d_model // 4
    shapes = [
        ("w_ode1", (D2, D2)), ("b_ode1", (1, D2)),
        ("wq1", (D2, D2)), ("wk1", (D2, D2)), ("wv1", (D2, D2)), ("wo1", (D2, D2)),
        ("g1", (1, D2)), ("be1", (1, D2)),
        ("w_ode2", (D4, D4)), ("b_ode2", (1, D4)),
        ("wq2", (D4, D4)), ("wk2", (D, D4)), ("wv2", (D, D4)), ("wo2", (D4, D4)),
        ("g2", (1, D4)), ("be2", (1, D4)),
        ("w_c1", (D, d_ff)), ("b_c1", (1, d_ff)),
        ("w_c2", (d_ff, D)), ("b_c2", (1, D)),
        ("g3", (1, D)), ("be3", (1, D)),
    ]
    keys = jax.random.split(key, len(shapes))
    params = []
    for (name, shp), k in zip(shapes, keys):
        if name.startswith("g"):          # LayerNorm gamma
            params.append(jnp.ones(shp, jnp.float32))
        elif name.startswith("be"):       # LayerNorm beta
            params.append(jnp.zeros(shp, jnp.float32))
        elif name.startswith("b_"):       # conv biases
            params.append(0.1 * jax.random.normal(k, shp, jnp.float32))
        else:                             # weights: scaled normal (1/sqrt(fan_in))
            params.append(jax.random.normal(k, shp, jnp.float32) / math.sqrt(shp[0]))
    return params


# TODO(synk): dropout is treated as identity (eval mode); no Pallas-side RNG dropout.

if __name__ == "__main__":
    B, L, S, d_model = 8, 8, 8, 128      # lane-dense output (D = 128)
    d_ff = 4 * d_model

    key = jax.random.PRNGKey(0)
    kx, kc, kp = jax.random.split(key, 3)
    x = jax.random.normal(kx, (B, L, d_model), jnp.float32)
    cross = jax.random.normal(kc, (B, S, d_model), jnp.float32)
    params = init_params(kp, d_model, d_ff)
    kparams = prepare_kernel_params(params)

    out = decoder_layer1_pallas(x, cross, kparams)
    out = jax.block_until_ready(out)

    # pure-JAX f32 reference (faithful split/concat structure), vmapped over batch
    ref = jax.vmap(lambda xb, cb: _forward_single_ref(xb, cb, params))(x, cross)

    assert out.shape == (B, L, d_model)
    err = float(jnp.max(jnp.abs(out - ref)))
    # bf16 matmuls + approx reciprocal + weight folding => looser tolerance than f32.
    assert jnp.allclose(out, ref, atol=5e-2, rtol=5e-2), err
    print("KERNEL_OK")
</pallas_src>

<mosaic_0001>
module attributes {stable_mosaic.version = 11 : i64} {
  func.func @_decoder_layer_kernel(%arg0: i32, %arg1: memref<4x8x128xf32, #tpu.memory_space<vmem>>, %arg2: memref<4x8x128xf32, #tpu.memory_space<vmem>>, %arg3: memref<128x64xbf16, #tpu.memory_space<vmem>>, %arg4: memref<64x64xbf16, #tpu.memory_space<vmem>>, %arg5: memref<64x64xbf16, #tpu.memory_space<vmem>>, %arg6: memref<64x64xbf16, #tpu.memory_space<vmem>>, %arg7: memref<64x64xbf16, #tpu.memory_space<vmem>>, %arg8: memref<1x64xf32, #tpu.memory_space<vmem>>, %arg9: memref<1x64xf32, #tpu.memory_space<vmem>>, %arg10: memref<64x32xbf16, #tpu.memory_space<vmem>>, %arg11: memref<32x32xbf16, #tpu.memory_space<vmem>>, %arg12: memref<128x32xbf16, #tpu.memory_space<vmem>>, %arg13: memref<128x32xbf16, #tpu.memory_space<vmem>>, %arg14: memref<32x32xbf16, #tpu.memory_space<vmem>>, %arg15: memref<1x32xf32, #tpu.memory_space<vmem>>, %arg16: memref<1x32xf32, #tpu.memory_space<vmem>>, %arg17: memref<128x512xbf16, #tpu.memory_space<vmem>>, %arg18: memref<64x512xbf16, #tpu.memory_space<vmem>>, %arg19: memref<32x512xbf16, #tpu.memory_space<vmem>>, %arg20: memref<1x512xf32, #tpu.memory_space<vmem>>, %arg21: memref<512x128xbf16, #tpu.memory_space<vmem>>, %arg22: memref<1x128xf32, #tpu.memory_space<vmem>>, %arg23: memref<1x128xf32, #tpu.memory_space<vmem>>, %arg24: memref<1x128xf32, #tpu.memory_space<vmem>>, %arg25: memref<4x8x128xf32, #tpu.memory_space<vmem>>) attributes {dimension_semantics = [#tpu.dimension_semantics<parallel>], iteration_bounds = array<i64: 2>, scalar_prefetch = 0 : i64, scratch_operands = 0 : i64, tpu.core_type = #tpu.core_type<tc>, window_params = [{transform_indices = @transform_0, window_bounds = array<i64: 4, 8, 128>}, {transform_indices = @transform_1, window_bounds = array<i64: 4, 8, 128>}, {pipeline_mode = #tpu.pipeline_mode<synchronous>, transform_indices = @transform_2, window_bounds = array<i64: 128, 64>}, {pipeline_mode = #tpu.pipeline_mode<synchronous>, transform_indices = @transform_3, window_bounds = array<i64: 64, 64>}, {pipeline_mode = #tpu.pipeline_mode<synchronous>, transform_indices = @transform_4, window_bounds = array<i64: 64, 64>}, {pipeline_mode = #tpu.pipeline_mode<synchronous>, transform_indices = @transform_5, window_bounds = array<i64: 64, 64>}, {pipeline_mode = #tpu.pipeline_mode<synchronous>, transform_indices = @transform_6, window_bounds = array<i64: 64, 64>}, {pipeline_mode = #tpu.pipeline_mode<synchronous>, transform_indices = @transform_7, window_bounds = array<i64: 1, 64>}, {pipeline_mode = #tpu.pipeline_mode<synchronous>, transform_indices = @transform_8, window_bounds = array<i64: 1, 64>}, {pipeline_mode = #tpu.pipeline_mode<synchronous>, transform_indices = @transform_9, window_bounds = array<i64: 64, 32>}, {pipeline_mode = #tpu.pipeline_mode<synchronous>, transform_indices = @transform_10, window_bounds = array<i64: 32, 32>}, {pipeline_mode = #tpu.pipeline_mode<synchronous>, transform_indices = @transform_11, window_bounds = array<i64: 128, 32>}, {pipeline_mode = #tpu.pipeline_mode<synchronous>, transform_indices = @transform_12, window_bounds = array<i64: 128, 32>}, {pipeline_mode = #tpu.pipeline_mode<synchronous>, transform_indices = @transform_13, window_bounds = array<i64: 32, 32>}, {pipeline_mode = #tpu.pipeline_mode<synchronous>, transform_indices = @transform_14, window_bounds = array<i64: 1, 32>}, {pipeline_mode = #tpu.pipeline_mode<synchronous>, transform_indices = @transform_15, window_bounds = array<i64: 1, 32>}, {pipeline_mode = #tpu.pipeline_mode<synchronous>, transform_indices = @transform_16, window_bounds = array<i64: 128, 512>}, {pipeline_mode = #tpu.pipeline_mode<synchronous>, transform_indices = @transform_17, window_bounds = array<i64: 64, 512>}, {pipeline_mode = #tpu.pipeline_mode<synchronous>, transform_indices = @transform_18, window_bounds = array<i64: 32, 512>}, {pipeline_mode = #tpu.pipeline_mode<synchronous>, transform_indices = @transform_19, window_bounds = array<i64: 1, 512>}, {pipeline_mode = #tpu.pipeline_mode<synchronous>, transform_indices = @transform_20, window_bounds = array<i64: 512, 128>}, {pipeline_mode = #tpu.pipeline_mode<synchronous>, transform_indices = @transform_21, window_bounds = array<i64: 1, 128>}, {pipeline_mode = #tpu.pipeline_mode<synchronous>, transform_indices = @transform_22, window_bounds = array<i64: 1, 128>}, {pipeline_mode = #tpu.pipeline_mode<synchronous>, transform_indices = @transform_23, window_bounds = array<i64: 1, 128>}, {transform_indices = @transform_24, window_bounds = array<i64: 4, 8, 128>}]} {
    %c0 = arith.constant 0 : index
    %c0_0 = arith.constant 0 : index
    %c0_1 = arith.constant 0 : index
    %0 = vector.load %arg1[%c0, %c0_0, %c0_1] : memref<4x8x128xf32, #tpu.memory_space<vmem>>, vector<4x8x128xf32>
    %1 = vector.shape_cast %0 : vector<4x8x128xf32> to vector<32x128xf32>
    %2 = arith.truncf %1 : vector<32x128xf32> to vector<32x128xbf16>
    %c0_2 = arith.constant 0 : index
    %c0_3 = arith.constant 0 : index
    %3 = vector.load %arg3[%c0_2, %c0_3] : memref<128x64xbf16, #tpu.memory_space<vmem>>, vector<128x64xbf16>
    %cst = arith.constant dense<0.000000e+00> : vector<32x64xf32>
    %4 = tpu.matmul %2, %3, %cst {dimension_numbers = #tpu.dot_dimension_numbers<[1], [0], [0], [1], [0, 0, 1, 1], [], []>} : vector<32x128xbf16>, vector<128x64xbf16>, vector<32x64xf32> -> vector<32x64xf32>
    %5 = arith.truncf %4 : vector<32x64xf32> to vector<32x64xbf16>
    %c0_4 = arith.constant 0 : index
    %c0_5 = arith.constant 0 : index
    %6 = vector.load %arg4[%c0_4, %c0_5] : memref<64x64xbf16, #tpu.memory_space<vmem>>, vector<64x64xbf16>
    %cst_6 = arith.constant dense<0.000000e+00> : vector<32x64xf32>
    %7 = tpu.matmul %5, %6, %cst_6 {dimension_numbers = #tpu.dot_dimension_numbers<[1], [0], [0], [1], [0, 0, 1, 1], [], []>} : vector<32x64xbf16>, vector<64x64xbf16>, vector<32x64xf32> -> vector<32x64xf32>
    %8 = vector.shape_cast %7 : vector<32x64xf32> to vector<4x8x64xf32>
    %9 = arith.truncf %4 : vector<32x64xf32> to vector<32x64xbf16>
    %c0_7 = arith.constant 0 : index
    %c0_8 = arith.constant 0 : index
    %10 = vector.load %arg5[%c0_7, %c0_8] : memref<64x64xbf16, #tpu.memory_space<vmem>>, vector<64x64xbf16>
    %cst_9 = arith.constant dense<0.000000e+00> : vector<32x64xf32>
    %11 = tpu.matmul %9, %10, %cst_9 {dimension_numbers = #tpu.dot_dimension_numbers<[1], [0], [0], [1], [0, 0, 1, 1], [], []>} : vector<32x64xbf16>, vector<64x64xbf16>, vector<32x64xf32> -> vector<32x64xf32>
    %12 = vector.shape_cast %11 : vector<32x64xf32> to vector<4x8x64xf32>
    %13 = arith.truncf %4 : vector<32x64xf32> to vector<32x64xbf16>
    %c0_10 = arith.constant 0 : index
    %c0_11 = arith.constant 0 : index
    %14 = vector.load %arg6[%c0_10, %c0_11] : memref<64x64xbf16, #tpu.memory_space<vmem>>, vector<64x64xbf16>
    %cst_12 = arith.constant dense<0.000000e+00> : vector<32x64xf32>
    %15 = tpu.matmul %13, %14, %cst_12 {dimension_numbers = #tpu.dot_dimension_numbers<[1], [0], [0], [1], [0, 0, 1, 1], [], []>} : vector<32x64xbf16>, vector<64x64xbf16>, vector<32x64xf32> -> vector<32x64xf32>
    %16 = vector.shape_cast %15 : vector<32x64xf32> to vector<4x8x64xf32>
    %17 = arith.truncf %8 : vector<4x8x64xf32> to vector<4x8x64xbf16>
    %18 = arith.truncf %12 : vector<4x8x64xf32> to vector<4x8x64xbf16>
    "tpu.trace_start"() <{level = 10 : i32, message = "bqd,bkd->bqk"}> : () -> ()
    %cst_13 = arith.constant dense<0.000000e+00> : vector<4x8x8xf32>
    %19 = tpu.matmul %17, %18, %cst_13 {dimension_numbers = #tpu.dot_dimension_numbers<[2], [2], [1], [1], [0, 0, 0, 1, 1, 1], [0], [0]>} : vector<4x8x64xbf16>, vector<4x8x64xbf16>, vector<4x8x8xf32> -> vector<4x8x8xf32>
    "tpu.trace_stop"() : () -> ()
    %cst_14 = arith.constant 1.250000e-01 : f32
    %20 = vector.broadcast %cst_14 : f32 to vector<4x8x8xf32>
    %21 = arith.mulf %19, %20 : vector<4x8x8xf32>
    %cst_15 = arith.constant dense<0xFF800000> : vector<4x8xf32>
    %22 = vector.multi_reduction <maximumf>, %21, %cst_15 [2] : vector<4x8x8xf32> to vector<4x8xf32>
    %23 = vector.shape_cast %22 : vector<4x8xf32> to vector<4x8x1xf32>
    %24 = vector.broadcast %23 : vector<4x8x1xf32> to vector<4x8x8xf32>
    %25 = arith.subf %21, %24 : vector<4x8x8xf32>
    %26 = math.exp %25 : vector<4x8x8xf32>
    %cst_16 = arith.constant dense<0.000000e+00> : vector<4x8xf32>
    %27 = vector.multi_reduction <add>, %26, %cst_16 [2] : vector<4x8x8xf32> to vector<4x8xf32>
    %28 = vector.shape_cast %27 : vector<4x8xf32> to vector<4x8x1xf32>
    %29 = tpu.reciprocal %28 {approx = true} : vector<4x8x1xf32> -> vector<4x8x1xf32>
    %30 = vector.broadcast %29 : vector<4x8x1xf32> to vector<4x8x8xf32>
    %31 = arith.mulf %26, %30 : vector<4x8x8xf32>
    %32 = arith.truncf %31 : vector<4x8x8xf32> to vector<4x8x8xbf16>
    %33 = arith.truncf %16 : vector<4x8x64xf32> to vector<4x8x64xbf16>
    "tpu.trace_start"() <{level = 10 : i32, message = "bqk,bkd->bqd"}> : () -> ()
    %cst_17 = arith.constant dense<0.000000e+00> : vector<4x8x64xf32>
    %34 = tpu.matmul %32, %33, %cst_17 {dimension_numbers = #tpu.dot_dimension_numbers<[2], [1], [1], [2], [0, 0, 0, 1, 1, 2], [0], [0]>} : vector<4x8x8xbf16>, vector<4x8x64xbf16>, vector<4x8x64xf32> -> vector<4x8x64xf32>
    "tpu.trace_stop"() : () -> ()
    %35 = vector.shape_cast %34 : vector<4x8x64xf32> to vector<32x64xf32>
    %36 = arith.truncf %35 : vector<32x64xf32> to vector<32x64xbf16>
    %c0_18 = arith.constant 0 : index
    %c0_19 = arith.constant 0 : index
    %37 = vector.load %arg7[%c0_18, %c0_19] : memref<64x64xbf16, #tpu.memory_space<vmem>>, vector<64x64xbf16>
    %cst_20 = arith.constant dense<0.000000e+00> : vector<32x64xf32>
    %38 = tpu.matmul %36, %37, %cst_20 {dimension_numbers = #tpu.dot_dimension_numbers<[1], [0], [0], [1], [0, 0, 1, 1], [], []>} : vector<32x64xbf16>, vector<64x64xbf16>, vector<32x64xf32> -> vector<32x64xf32>
    %39 = arith.addf %4, %38 : vector<32x64xf32>
    %c0_21 = arith.constant 0 : index
    %c0_22 = arith.constant 0 : index
    %40 = vector.load %arg8[%c0_21, %c0_22] : memref<1x64xf32, #tpu.memory_space<vmem>>, vector<1x64xf32>
    %c0_23 = arith.constant 0 : index
    %c0_24 = arith.constant 0 : index
    %41 = vector.load %arg9[%c0_23, %c0_24] : memref<1x64xf32, #tpu.memory_space<vmem>>, vector<1x64xf32>
    %cst_25 = arith.constant dense<0.000000e+00> : vector<32xf32>
    %42 = vector.multi_reduction <add>, %39, %cst_25 [1] : vector<32x64xf32> to vector<32xf32>
    %43 = vector.shape_cast %42 : vector<32xf32> to vector<32x1xf32>
    %cst_26 = arith.constant 6.400000e+01 : f32
    %44 = vector.broadcast %cst_26 : f32 to vector<32x1xf32>
    %45 = arith.divf %43, %44 : vector<32x1xf32>
    %46 = vector.broadcast %45 : vector<32x1xf32> to vector<32x64xf32>
    %47 = arith.subf %39, %46 : vector<32x64xf32>
    %48 = arith.mulf %47, %47 : vector<32x64xf32>
    %cst_27 = arith.constant dense<0.000000e+00> : vector<32xf32>
    %49 = vector.multi_reduction <add>, %48, %cst_27 [1] : vector<32x64xf32> to vector<32xf32>
    %50 = vector.shape_cast %49 : vector<32xf32> to vector<32x1xf32>
    %cst_28 = arith.constant 6.400000e+01 : f32
    %51 = vector.broadcast %cst_28 : f32 to vector<32x1xf32>
    %52 = arith.divf %50, %51 : vector<32x1xf32>
    %cst_29 = arith.constant 9.99999974E-6 : f32
    %53 = vector.broadcast %cst_29 : f32 to vector<32x1xf32>
    %54 = arith.addf %52, %53 : vector<32x1xf32>
    %55 = math.rsqrt %54 : vector<32x1xf32>
    %56 = vector.broadcast %55 : vector<32x1xf32> to vector<32x64xf32>
    %57 = arith.mulf %47, %56 : vector<32x64xf32>
    %58 = vector.broadcast %40 : vector<1x64xf32> to vector<32x64xf32>
    %59 = arith.mulf %57, %58 : vector<32x64xf32>
    %60 = vector.broadcast %41 : vector<1x64xf32> to vector<32x64xf32>
    %61 = arith.addf %59, %60 : vector<32x64xf32>
    %62 = arith.truncf %61 : vector<32x64xf32> to vector<32x64xbf16>
    %c0_30 = arith.constant 0 : index
    %c0_31 = arith.constant 0 : index
    %63 = vector.load %arg10[%c0_30, %c0_31] : memref<64x32xbf16, #tpu.memory_space<vmem>>, vector<64x32xbf16>
    %cst_32 = arith.constant dense<0.000000e+00> : vector<32x32xf32>
    %64 = tpu.matmul %62, %63, %cst_32 {dimension_numbers = #tpu.dot_dimension_numbers<[1], [0], [0], [1], [0, 0, 1, 1], [], []>} : vector<32x64xbf16>, vector<64x32xbf16>, vector<32x32xf32> -> vector<32x32xf32>
    %65 = arith.truncf %64 : vector<32x32xf32> to vector<32x32xbf16>
    %c0_33 = arith.constant 0 : index
    %c0_34 = arith.constant 0 : index
    %66 = vector.load %arg11[%c0_33, %c0_34] : memref<32x32xbf16, #tpu.memory_space<vmem>>, vector<32x32xbf16>
    %cst_35 = arith.constant dense<0.000000e+00> : vector<32x32xf32>
    %67 = tpu.matmul %65, %66, %cst_35 {dimension_numbers = #tpu.dot_dimension_numbers<[1], [0], [0], [1], [0, 0, 1, 1], [], []>} : vector<32x32xbf16>, vector<32x32xbf16>, vector<32x32xf32> -> vector<32x32xf32>
    %68 = vector.shape_cast %67 : vector<32x32xf32> to vector<4x8x32xf32>
    %c0_36 = arith.constant 0 : index
    %c0_37 = arith.constant 0 : index
    %c0_38 = arith.constant 0 : index
    %69 = vector.load %arg2[%c0_36, %c0_37, %c0_38] : memref<4x8x128xf32, #tpu.memory_space<vmem>>, vector<4x8x128xf32>
    %70 = vector.shape_cast %69 : vector<4x8x128xf32> to vector<32x128xf32>
    %71 = arith.truncf %70 : vector<32x128xf32> to vector<32x128xbf16>
    %c0_39 = arith.constant 0 : index
    %c0_40 = arith.constant 0 : index
    %72 = vector.load %arg12[%c0_39, %c0_40] : memref<128x32xbf16, #tpu.memory_space<vmem>>, vector<128x32xbf16>
    %cst_41 = arith.constant dense<0.000000e+00> : vector<32x32xf32>
    %73 = tpu.matmul %71, %72, %cst_41 {dimension_numbers = #tpu.dot_dimension_numbers<[1], [0], [0], [1], [0, 0, 1, 1], [], []>} : vector<32x128xbf16>, vector<128x32xbf16>, vector<32x32xf32> -> vector<32x32xf32>
    %74 = vector.shape_cast %73 : vector<32x32xf32> to vector<4x8x32xf32>
    %c0_42 = arith.constant 0 : index
    %c0_43 = arith.constant 0 : index
    %75 = vector.load %arg13[%c0_42, %c0_43] : memref<128x32xbf16, #tpu.memory_space<vmem>>, vector<128x32xbf16>
    %cst_44 = arith.constant dense<0.000000e+00> : vector<32x32xf32>
    %76 = tpu.matmul %71, %75, %cst_44 {dimension_numbers = #tpu.dot_dimension_numbers<[1], [0], [0], [1], [0, 0, 1, 1], [], []>} : vector<32x128xbf16>, vector<128x32xbf16>, vector<32x32xf32> -> vector<32x32xf32>
    %77 = vector.shape_cast %76 : vector<32x32xf32> to vector<4x8x32xf32>
    %78 = arith.truncf %68 : vector<4x8x32xf32> to vector<4x8x32xbf16>
    %79 = arith.truncf %74 : vector<4x8x32xf32> to vector<4x8x32xbf16>
    "tpu.trace_start"() <{level = 10 : i32, message = "bqd,bkd->bqk"}> : () -> ()
    %cst_45 = arith.constant dense<0.000000e+00> : vector<4x8x8xf32>
    %80 = tpu.matmul %78, %79, %cst_45 {dimension_numbers = #tpu.dot_dimension_numbers<[2], [2], [1], [1], [0, 0, 0, 1, 1, 1], [0], [0]>} : vector<4x8x32xbf16>, vector<4x8x32xbf16>, vector<4x8x8xf32> -> vector<4x8x8xf32>
    "tpu.trace_stop"() : () -> ()
    %cst_46 = arith.constant 0.176776692 : f32
    %81 = vector.broadcast %cst_46 : f32 to vector<4x8x8xf32>
    %82 = arith.mulf %80, %81 : vector<4x8x8xf32>
    %cst_47 = arith.constant dense<0xFF800000> : vector<4x8xf32>
    %83 = vector.multi_reduction <maximumf>, %82, %cst_47 [2] : vector<4x8x8xf32> to vector<4x8xf32>
    %84 = vector.shape_cast %83 : vector<4x8xf32> to vector<4x8x1xf32>
    %85 = vector.broadcast %84 : vector<4x8x1xf32> to vector<4x8x8xf32>
    %86 = arith.subf %82, %85 : vector<4x8x8xf32>
    %87 = math.exp %86 : vector<4x8x8xf32>
    %cst_48 = arith.constant dense<0.000000e+00> : vector<4x8xf32>
    %88 = vector.multi_reduction <add>, %87, %cst_48 [2] : vector<4x8x8xf32> to vector<4x8xf32>
    %89 = vector.shape_cast %88 : vector<4x8xf32> to vector<4x8x1xf32>
    %90 = tpu.reciprocal %89 {approx = true} : vector<4x8x1xf32> -> vector<4x8x1xf32>
    %91 = vector.broadcast %90 : vector<4x8x1xf32> to vector<4x8x8xf32>
    %92 = arith.mulf %87, %91 : vector<4x8x8xf32>
    %93 = arith.truncf %92 : vector<4x8x8xf32> to vector<4x8x8xbf16>
    %94 = arith.truncf %77 : vector<4x8x32xf32> to vector<4x8x32xbf16>
    "tpu.trace_start"() <{level = 10 : i32, message = "bqk,bkd->bqd"}> : () -> ()
    %cst_49 = arith.constant dense<0.000000e+00> : vector<4x8x32xf32>
    %95 = tpu.matmul %93, %94, %cst_49 {dimension_numbers = #tpu.dot_dimension_numbers<[2], [1], [1], [2], [0, 0, 0, 1, 1, 2], [0], [0]>} : vector<4x8x8xbf16>, vector<4x8x32xbf16>, vector<4x8x32xf32> -> vector<4x8x32xf32>
    "tpu.trace_stop"() : () -> ()
    %96 = vector.shape_cast %95 : vector<4x8x32xf32> to vector<32x32xf32>
    %97 = arith.truncf %96 : vector<32x32xf32> to vector<32x32xbf16>
    %c0_50 = arith.constant 0 : index
    %c0_51 = arith.constant 0 : index
    %98 = vector.load %arg14[%c0_50, %c0_51] : memref<32x32xbf16, #tpu.memory_space<vmem>>, vector<32x32xbf16>
    %cst_52 = arith.constant dense<0.000000e+00> : vector<32x32xf32>
    %99 = tpu.matmul %97, %98, %cst_52 {dimension_numbers = #tpu.dot_dimension_numbers<[1], [0], [0], [1], [0, 0, 1, 1], [], []>} : vector<32x32xbf16>, vector<32x32xbf16>, vector<32x32xf32> -> vector<32x32xf32>
    %100 = arith.addf %64, %99 : vector<32x32xf32>
    %c0_53 = arith.constant 0 : index
    %c0_54 = arith.constant 0 : index
    %101 = vector.load %arg15[%c0_53, %c0_54] : memref<1x32xf32, #tpu.memory_space<vmem>>, vector<1x32xf32>
    %c0_55 = arith.constant 0 : index
    %c0_56 = arith.constant 0 : index
    %102 = vector.load %arg16[%c0_55, %c0_56] : memref<1x32xf32, #tpu.memory_space<vmem>>, vector<1x32xf32>
    %cst_57 = arith.constant dense<0.000000e+00> : vector<32xf32>
    %103 = vector.multi_reduction <add>, %100, %cst_57 [1] : vector<32x32xf32> to vector<32xf32>
    %104 = vector.shape_cast %103 : vector<32xf32> to vector<32x1xf32>
    %cst_58 = arith.constant 3.200000e+01 : f32
    %105 = vector.broadcast %cst_58 : f32 to vector<32x1xf32>
    %106 = arith.divf %104, %105 : vector<32x1xf32>
    %107 = vector.broadcast %106 : vector<32x1xf32> to vector<32x32xf32>
    %108 = arith.subf %100, %107 : vector<32x32xf32>
    %109 = arith.mulf %108, %108 : vector<32x32xf32>
    %cst_59 = arith.constant dense<0.000000e+00> : vector<32xf32>
    %110 = vector.multi_reduction <add>, %109, %cst_59 [1] : vector<32x32xf32> to vector<32xf32>
    %111 = vector.shape_cast %110 : vector<32xf32> to vector<32x1xf32>
    %cst_60 = arith.constant 3.200000e+01 : f32
    %112 = vector.broadcast %cst_60 : f32 to vector<32x1xf32>
    %113 = arith.divf %111, %112 : vector<32x1xf32>
    %cst_61 = arith.constant 9.99999974E-6 : f32
    %114 = vector.broadcast %cst_61 : f32 to vector<32x1xf32>
    %115 = arith.addf %113, %114 : vector<32x1xf32>
    %116 = math.rsqrt %115 : vector<32x1xf32>
    %117 = vector.broadcast %116 : vector<32x1xf32> to vector<32x32xf32>
    %118 = arith.mulf %108, %117 : vector<32x32xf32>
    %119 = vector.broadcast %101 : vector<1x32xf32> to vector<32x32xf32>
    %120 = arith.mulf %118, %119 : vector<32x32xf32>
    %121 = vector.broadcast %102 : vector<1x32xf32> to vector<32x32xf32>
    %122 = arith.addf %120, %121 : vector<32x32xf32>
    %c0_62 = arith.constant 0 : index
    %c0_63 = arith.constant 0 : index
    %123 = vector.load %arg17[%c0_62, %c0_63] : memref<128x512xbf16, #tpu.memory_space<vmem>>, vector<128x512xbf16>
    %cst_64 = arith.constant dense<0.000000e+00> : vector<32x512xf32>
    %124 = tpu.matmul %2, %123, %cst_64 {dimension_numbers = #tpu.dot_dimension_numbers<[1], [0], [0], [1], [0, 0, 1, 1], [], []>} : vector<32x128xbf16>, vector<128x512xbf16>, vector<32x512xf32> -> vector<32x512xf32>
    %125 = arith.truncf %61 : vector<32x64xf32> to vector<32x64xbf16>
    %c0_65 = arith.constant 0 : index
    %c0_66 = arith.constant 0 : index
    %126 = vector.load %arg18[%c0_65, %c0_66] : memref<64x512xbf16, #tpu.memory_space<vmem>>, vector<64x512xbf16>
    %cst_67 = arith.constant dense<0.000000e+00> : vector<32x512xf32>
    %127 = tpu.matmul %125, %126, %cst_67 {dimension_numbers = #tpu.dot_dimension_numbers<[1], [0], [0], [1], [0, 0, 1, 1], [], []>} : vector<32x64xbf16>, vector<64x512xbf16>, vector<32x512xf32> -> vector<32x512xf32>
    %128 = arith.addf %124, %127 : vector<32x512xf32>
    %129 = arith.truncf %122 : vector<32x32xf32> to vector<32x32xbf16>
    %c0_68 = arith.constant 0 : index
    %c0_69 = arith.constant 0 : index
    %130 = vector.load %arg19[%c0_68, %c0_69] : memref<32x512xbf16, #tpu.memory_space<vmem>>, vector<32x512xbf16>
    %cst_70 = arith.constant dense<0.000000e+00> : vector<32x512xf32>
    %131 = tpu.matmul %129, %130, %cst_70 {dimension_numbers = #tpu.dot_dimension_numbers<[1], [0], [0], [1], [0, 0, 1, 1], [], []>} : vector<32x32xbf16>, vector<32x512xbf16>, vector<32x512xf32> -> vector<32x512xf32>
    %132 = arith.addf %128, %131 : vector<32x512xf32>
    %c0_71 = arith.constant 0 : index
    %c0_72 = arith.constant 0 : index
    %133 = vector.load %arg20[%c0_71, %c0_72] : memref<1x512xf32, #tpu.memory_space<vmem>>, vector<1x512xf32>
    %134 = vector.broadcast %133 : vector<1x512xf32> to vector<32x512xf32>
    %135 = arith.addf %132, %134 : vector<32x512xf32>
    %cst_73 = arith.constant 0.000000e+00 : f32
    %136 = vector.broadcast %cst_73 : f32 to vector<32x512xf32>
    %137 = arith.maximumf %135, %136 : vector<32x512xf32>
    %138 = arith.truncf %137 : vector<32x512xf32> to vector<32x512xbf16>
    %c0_74 = arith.constant 0 : index
    %c0_75 = arith.constant 0 : index
    %139 = vector.load %arg21[%c0_74, %c0_75] : memref<512x128xbf16, #tpu.memory_space<vmem>>, vector<512x128xbf16>
    %cst_76 = arith.constant dense<0.000000e+00> : vector<32x128xf32>
    %140 = tpu.matmul %138, %139, %cst_76 {dimension_numbers = #tpu.dot_dimension_numbers<[1], [0], [0], [1], [0, 0, 1, 1], [], []>} : vector<32x512xbf16>, vector<512x128xbf16>, vector<32x128xf32> -> vector<32x128xf32>
    %c0_77 = arith.constant 0 : index
    %c0_78 = arith.constant 0 : index
    %141 = vector.load %arg22[%c0_77, %c0_78] : memref<1x128xf32, #tpu.memory_space<vmem>>, vector<1x128xf32>
    %142 = vector.broadcast %141 : vector<1x128xf32> to vector<32x128xf32>
    %143 = arith.addf %140, %142 : vector<32x128xf32>
    %144 = arith.addf %1, %143 : vector<32x128xf32>
    %c0_79 = arith.constant 0 : index
    %c0_80 = arith.constant 0 : index
    %145 = vector.load %arg23[%c0_79, %c0_80] : memref<1x128xf32, #tpu.memory_space<vmem>>, vector<1x128xf32>
    %c0_81 = arith.constant 0 : index
    %c0_82 = arith.constant 0 : index
    %146 = vector.load %arg24[%c0_81, %c0_82] : memref<1x128xf32, #tpu.memory_space<vmem>>, vector<1x128xf32>
    %cst_83 = arith.constant dense<0.000000e+00> : vector<32xf32>
    %147 = vector.multi_reduction <add>, %144, %cst_83 [1] : vector<32x128xf32> to vector<32xf32>
    %148 = vector.shape_cast %147 : vector<32xf32> to vector<32x1xf32>
    %cst_84 = arith.constant 1.280000e+02 : f32
    %149 = vector.broadcast %cst_84 : f32 to vector<32x1xf32>
    %150 = arith.divf %148, %149 : vector<32x1xf32>
    %151 = vector.broadcast %150 : vector<32x1xf32> to vector<32x128xf32>
    %152 = arith.subf %144, %151 : vector<32x128xf32>
    %153 = arith.mulf %152, %152 : vector<32x128xf32>
    %cst_85 = arith.constant dense<0.000000e+00> : vector<32xf32>
    %154 = vector.multi_reduction <add>, %153, %cst_85 [1] : vector<32x128xf32> to vector<32xf32>
    %155 = vector.shape_cast %154 : vector<32xf32> to vector<32x1xf32>
    %cst_86 = arith.constant 1.280000e+02 : f32
    %156 = vector.broadcast %cst_86 : f32 to vector<32x1xf32>
    %157 = arith.divf %155, %156 : vector<32x1xf32>
    %cst_87 = arith.constant 9.99999974E-6 : f32
    %158 = vector.broadcast %cst_87 : f32 to vector<32x1xf32>
    %159 = arith.addf %157, %158 : vector<32x1xf32>
    %160 = math.rsqrt %159 : vector<32x1xf32>
    %161 = vector.broadcast %160 : vector<32x1xf32> to vector<32x128xf32>
    %162 = arith.mulf %152, %161 : vector<32x128xf32>
    %163 = vector.broadcast %145 : vector<1x128xf32> to vector<32x128xf32>
    %164 = arith.mulf %162, %163 : vector<32x128xf32>
    %165 = vector.broadcast %146 : vector<1x128xf32> to vector<32x128xf32>
    %166 = arith.addf %164, %165 : vector<32x128xf32>
    %167 = vector.shape_cast %166 : vector<32x128xf32> to vector<4x8x128xf32>
    %c0_88 = arith.constant 0 : index
    %c0_89 = arith.constant 0 : index
    %c0_90 = arith.constant 0 : index
    %168 = vector.load %arg25[%c0_88, %c0_89, %c0_90] : memref<4x8x128xf32, #tpu.memory_space<vmem>>, vector<4x8x128xf32>
    tpu.vector_store %arg25[%c0_88, %c0_89, %c0_90], %167 {strides = array<i32>} : memref<4x8x128xf32, #tpu.memory_space<vmem>>, vector<4x8x128xf32>,
    return
  }
  func.func @transform_0(%arg0: i32) -> (i32, i32, i32) {
    %c0_i32 = arith.constant 0 : i32
    %c0_i32_0 = arith.constant 0 : i32
    %c0_i32_1 = arith.constant 0 : i32
    return %arg0, %c0_i32, %c0_i32_0 : i32, i32, i32
  }
  func.func @transform_1(%arg0: i32) -> (i32, i32, i32) {
    %c0_i32 = arith.constant 0 : i32
    %c0_i32_0 = arith.constant 0 : i32
    %c0_i32_1 = arith.constant 0 : i32
    return %arg0, %c0_i32, %c0_i32_0 : i32, i32, i32
  }
  func.func @transform_2(%arg0: i32) -> (i32, i32) {
    %c0_i32 = arith.constant 0 : i32
    %c0_i32_0 = arith.constant 0 : i32
    %c0_i32_1 = arith.constant 0 : i32
    return %c0_i32, %c0_i32_0 : i32, i32
  }
  func.func @transform_3(%arg0: i32) -> (i32, i32) {
    %c0_i32 = arith.constant 0 : i32
    %c0_i32_0 = arith.constant 0 : i32
    %c0_i32_1 = arith.constant 0 : i32
    return %c0_i32, %c0_i32_0 : i32, i32
  }
  func.func @transform_4(%arg0: i32) -> (i32, i32) {
    %c0_i32 = arith.constant 0 : i32
    %c0_i32_0 = arith.constant 0 : i32
    %c0_i32_1 = arith.constant 0 : i32
    return %c0_i32, %c0_i32_0 : i32, i32
  }
  func.func @transform_5(%arg0: i32) -> (i32, i32) {
    %c0_i32 = arith.constant 0 : i32
    %c0_i32_0 = arith.constant 0 : i32
    %c0_i32_1 = arith.constant 0 : i32
    return %c0_i32, %c0_i32_0 : i32, i32
  }
  func.func @transform_6(%arg0: i32) -> (i32, i32) {
    %c0_i32 = arith.constant 0 : i32
    %c0_i32_0 = arith.constant 0 : i32
    %c0_i32_1 = arith.constant 0 : i32
    return %c0_i32, %c0_i32_0 : i32, i32
  }
  func.func @transform_7(%arg0: i32) -> (i32, i32) {
    %c0_i32 = arith.constant 0 : i32
    %c0_i32_0 = arith.constant 0 : i32
    %c0_i32_1 = arith.constant 0 : i32
    return %c0_i32, %c0_i32_0 : i32, i32
  }
  func.func @transform_8(%arg0: i32) -> (i32, i32) {
    %c0_i32 = arith.constant 0 : i32
    %c0_i32_0 = arith.constant 0 : i32
    %c0_i32_1 = arith.constant 0 : i32
    return %c0_i32, %c0_i32_0 : i32, i32
  }
  func.func @transform_9(%arg0: i32) -> (i32, i32) {
    %c0_i32 = arith.constant 0 : i32
    %c0_i32_0 = arith.constant 0 : i32
    %c0_i32_1 = arith.constant 0 : i32
    return %c0_i32, %c0_i32_0 : i32, i32
  }
  func.func @transform_10(%arg0: i32) -> (i32, i32) {
    %c0_i32 = arith.constant 0 : i32
    %c0_i32_0 = arith.constant 0 : i32
    %c0_i32_1 = arith.constant 0 : i32
    return %c0_i32, %c0_i32_0 : i32, i32
  }
  func.func @transform_11(%arg0: i32) -> (i32, i32) {
    %c0_i32 = arith.constant 0 : i32
    %c0_i32_0 = arith.constant 0 : i32
    %c0_i32_1 = arith.constant 0 : i32
    return %c0_i32, %c0_i32_0 : i32, i32
  }
  func.func @transform_12(%arg0: i32) -> (i32, i32) {
    %c0_i32 = arith.constant 0 : i32
    %c0_i32_0 = arith.constant 0 : i32
    %c0_i32_1 = arith.constant 0 : i32
    return %c0_i32, %c0_i32_0 : i32, i32
  }
  func.func @transform_13(%arg0: i32) -> (i32, i32) {
    %c0_i32 = arith.constant 0 : i32
    %c0_i32_0 = arith.constant 0 : i32
    %c0_i32_1 = arith.constant 0 : i32
    return %c0_i32, %c0_i32_0 : i32, i32
  }
  func.func @transform_14(%arg0: i32) -> (i32, i32) {
    %c0_i32 = arith.constant 0 : i32
    %c0_i32_0 = arith.constant 0 : i32
    %c0_i32_1 = arith.constant 0 : i32
    return %c0_i32, %c0_i32_0 : i32, i32
  }
  func.func @transform_15(%arg0: i32) -> (i32, i32) {
    %c0_i32 = arith.constant 0 : i32
    %c0_i32_0 = arith.constant 0 : i32
    %c0_i32_1 = arith.constant 0 : i32
    return %c0_i32, %c0_i32_0 : i32, i32
  }
  func.func @transform_16(%arg0: i32) -> (i32, i32) {
    %c0_i32 = arith.constant 0 : i32
    %c0_i32_0 = arith.constant 0 : i32
    %c0_i32_1 = arith.constant 0 : i32
    return %c0_i32, %c0_i32_0 : i32, i32
  }
  func.func @transform_17(%arg0: i32) -> (i32, i32) {
    %c0_i32 = arith.constant 0 : i32
    %c0_i32_0 = arith.constant 0 : i32
    %c0_i32_1 = arith.constant 0 : i32
    return %c0_i32, %c0_i32_0 : i32, i32
  }
  func.func @transform_18(%arg0: i32) -> (i32, i32) {
    %c0_i32 = arith.constant 0 : i32
    %c0_i32_0 = arith.constant 0 : i32
    %c0_i32_1 = arith.constant 0 : i32
    return %c0_i32, %c0_i32_0 : i32, i32
  }
  func.func @transform_19(%arg0: i32) -> (i32, i32) {
    %c0_i32 = arith.constant 0 : i32
    %c0_i32_0 = arith.constant 0 : i32
    %c0_i32_1 = arith.constant 0 : i32
    return %c0_i32, %c0_i32_0 : i32, i32
  }
  func.func @transform_20(%arg0: i32) -> (i32, i32) {
    %c0_i32 = arith.constant 0 : i32
    %c0_i32_0 = arith.constant 0 : i32
    %c0_i32_1 = arith.constant 0 : i32
    return %c0_i32, %c0_i32_0 : i32, i32
  }
  func.func @transform_21(%arg0: i32) -> (i32, i32) {
    %c0_i32 = arith.constant 0 : i32
    %c0_i32_0 = arith.constant 0 : i32
    %c0_i32_1 = arith.constant 0 : i32
    return %c0_i32, %c0_i32_0 : i32, i32
  }
  func.func @transform_22(%arg0: i32) -> (i32, i32) {
    %c0_i32 = arith.constant 0 : i32
    %c0_i32_0 = arith.constant 0 : i32
    %c0_i32_1 = arith.constant 0 : i32
    return %c0_i32, %c0_i32_0 : i32, i32
  }
  func.func @transform_23(%arg0: i32) -> (i32, i32) {
    %c0_i32 = arith.constant 0 : i32
    %c0_i32_0 = arith.constant 0 : i32
    %c0_i32_1 = arith.constant 0 : i32
    return %c0_i32, %c0_i32_0 : i32, i32
  }
  func.func @transform_24(%arg0: i32) -> (i32, i32, i32) {
    %c0_i32 = arith.constant 0 : i32
    %c0_i32_0 = arith.constant 0 : i32
    %c0_i32_1 = arith.constant 0 : i32
    return %arg0, %c0_i32, %c0_i32_0 : i32, i32, i32
  }
}

</mosaic_0001>

<bundles_post_ra>
// kernel: tpu_custom_call.1
= control target key start
LH: loop header
LB: loop body
LE: loop exit
PB: predicated region body
PF: predicated region fallthrough
CT: control target
= control target key end

     0   :  { %s6560_s0 = inlined_call_operand.vmem [shape: f32[8,8,128], index: 0, kind: input, shape index: {}]   ;;  %s6561_s1 = inlined_call_operand.hbm [shape: f32[8,8,128], index: 1, kind: input, shape index: {}]   ;;  %s6562_s2 = inlined_call_operand.vmem [shape: bf16[128,64], index: 2, kind: input, shape index: {}]   ;;  %s6563_s3 = inlined_call_operand.vmem [shape: bf16[64,64], index: 3, kind: input, shape index: {}]   ;;  %s6564_s4 = inlined_call_operand.hbm [shape: bf16[64,64], index: 4, kind: input, shape index: {}]   ;;  %s6565_s5 = inlined_call_operand.hbm [shape: bf16[64,64], index: 5, kind: input, shape index: {}]   ;;  %s6566_s6 = inlined_call_operand.hbm [shape: bf16[64,64], index: 6, kind: input, shape index: {}]   ;;  %s6567_s7 = inlined_call_operand.vmem [shape: f32[1,64], index: 7, kind: input, shape index: {}]   ;;  %s6568_s8 = inlined_call_operand.vmem [shape: f32[1,64], index: 8, kind: input, shape index: {}]   ;;  %s6569_s9 = inlined_call_operand.vmem [shape: bf16[64,32], index: 9, kind: input, shape index: {}]   ;;  %s6570_s10 = inlined_call_operand.hbm [shape: bf16[32,32], index: 10, kind: input, shape index: {}]   ;;  %s6571_s11 = inlined_call_operand.vmem [shape: bf16[128,32], index: 11, kind: input, shape index: {}]   ;;  %s6572_s12 = inlined_call_operand.vmem [shape: bf16[128,32], index: 12, kind: input, shape index: {}]   ;;  %s6573_s13 = inlined_call_operand.hbm [shape: bf16[32,32], index: 13, kind: input, shape index: {}]   ;;  %s6574_s14 = inlined_call_operand.vmem [shape: f32[1,32], index: 14, kind: input, shape index: {}]   ;;  %s6575_s15 = inlined_call_operand.vmem [shape: f32[1,32], index: 15, kind: input, shape index: {}]   ;;  %s6576_s16 = inlined_call_operand.vmem [shape: bf16[128,512], index: 16, kind: input, shape index: {}]   ;;  %s6577_s17 = inlined_call_operand.hbm [shape: bf16[64,512], index: 17, kind: input, shape index: {}]   ;;  %s6578_s18 = inlined_call_operand.hbm [shape: bf16[32,512], index: 18, kind: input, shape index: {}]   ;;  %s6579_s19 = inlined_call_operand.vmem [shape: f32[1,512], index: 19, kind: input, shape index: {}]   ;;  %s6580_s20 = inlined_call_operand.hbm [shape: bf16[512,128], index: 20, kind: input, shape index: {}]   ;;  %s6581_s21 = inlined_call_operand.vmem [shape: f32[1,128], index: 21, kind: input, shape index: {}]   ;;  %s6582_s22 = inlined_call_operand.vmem [shape: f32[1,128], index: 22, kind: input, shape index: {}]   ;;  %s6583_s23 = inlined_call_operand.vmem [shape: f32[1,128], index: 23, kind: input, shape index: {}]   ;;  %s6584_s24 = inlined_call_operand.hbm [shape: f32[8,8,128], index: 24, kind: output, shape index: {}]  }
   0x1   :  { %6606 = sst [smem:[#allocation24_spill]] %s6560_s0 }
   0x2   :  { %6607 = sst [smem:[#allocation25_spill]] %s6561_s1 }
   0x3   :  { %6608 = sst [smem:[#allocation26_spill]] %s6562_s2 }
   0x4   :  { %6609 = sst [smem:[#allocation27_spill]] %s6563_s3 }
   0x5   :  { %6610 = sst [smem:[#allocation28_spill]] %s6564_s4 }
   0x6   :  { %6611 = sst [smem:[#allocation29_spill]] %s6565_s5 }
   0x7   :  { %6612 = sst [smem:[#allocation30_spill]] %s6566_s6 }
   0x8   :  { %6613 = sst [smem:[#allocation31_spill]] %s6567_s7 }
   0x9   :  { %6614 = sst [smem:[#allocation32_spill]] %s6568_s8 }
   0xa   :  { %6615 = sst [smem:[#allocation33_spill]] %s6569_s9 }
   0xb   :  { %6616 = sst [smem:[#allocation34_spill]] %s6570_s10 }
   0xc   :  { %6617 = sst [smem:[#allocation35_spill]] %s6572_s12 }
   0xd   :  { %6618 = sst [smem:[#allocation36_spill]] %s6573_s13 }
   0xe   :  { %6619 = sst [smem:[#allocation37_spill]] %s6574_s14 }
   0xf   :  { %6620 = sst [smem:[#allocation38_spill]] %s6575_s15 }
  0x10   :  { %6621 = sst [smem:[#allocation39_spill]] %s6576_s16 }
  0x11   :  { %6622 = sst [smem:[#allocation40_spill]] %s6579_s19 }
  0x12   :  { %6623 = sst [smem:[#allocation41_spill]] %s6581_s21 }
  0x13   :  { %6624 = sst [smem:[#allocation42_spill]] %s6582_s22 }
  0x14   :  { %6625 = sst [smem:[#allocation43_spill]] %s6583_s23 }
  0x15   :  { %6626 = sst [smem:[#allocation44_spill]] %s6584_s24 }
  0x16   :  { %29 = vsyncpa [#allocation3], 0 }
  0x17   :  { %31 = vsyncpa [#allocation3 + $0x1], 0 }
  0x18   :  { %32 = vsyncpa [#allocation6], 0 }
  0x19   :  { %33 = vsyncpa [#allocation9], 0 }
  0x1a   :  { %34 = vsyncpa [#allocation12], 0 }
  0x1b   :  { %35 = vsyncpa [#allocation15], 0 }
  0x1c   :  { %36 = vsyncpa [#allocation4], 0 }
  0x1d   :  { %38 = vsyncpa [#allocation4 + $0x1], 0  ;;  %s5681_s5 = smov 0   ;;  %s5683_s26 = smov 0  }
  0x1e   :  { %s5685_s27 = smov 0   ;;  %s5687_s28 = smov 0  }
  0x1f LB: > { %s5535_s6 = smov [#allocation5]   ;;  %s5702_s29 = sadd.s32 4294967295, %s5533_s28   ;;  %s5533_s28 = sphi %s5687_s28, %s6677_s28   ;;  %s5529_s27 = sphi %s5685_s27, %s6676_s27   ;;  %s5525_s26 = sphi %s5683_s26, %s6675_s26   ;;  %s5521_s5 = sphi %s5681_s5, %s6674_s5  }
  0x20   : > { %s607_s2 = sshll.u32 %s5535_s6, 4  ;;  %p4201_p0 = scmp.ge.s32.totalorder %s5533_s28, 1  ;;  %s5707_s2 = int_to_ptr.vmem [resolvable:$true] %s607_s2 }
  0x21   : > { %p6595_p1 = scmp.eq.s32.totalorder %s5702_s29, 0  ;;  %p589_p2 = scmp.lt.s32.totalorder %s5533_s28, 3 }
  0x22   : > { %s5536_s7 = smov [#allocation8]   ;;  %s5537_s25 = smov [#allocation11]  }
  0x23   : > { %p5709_p3 = pnand %p4201_p0, %p589_p2  ;;  %s633_s30 = sshll.u32 %s5536_s7, 4  ;;  %s5722_s30 = int_to_ptr.vmem [resolvable:$true] %s633_s30 }
  0x24   : > { %s674_s8 = sshll.u32 %s5537_s25, 4  ;;  %s6629_s6 = sld [smem:[#allocation28_spill]]  ;;  %s5724_s8 = int_to_ptr.vmem [resolvable:$true] %s674_s8 }
  0x25   : > { %s6627_s0 = scalar_select %p5709_p3, 1, 0 }
  0x26   : > { %p4871_p5 = pneg %p5709_p3 }
  0x28   : > { %p5718_p6 = pnand %p4871_p5, %p6595_p1 }
  0x2a   : > { %s5197_s24 = scalar_lea.hbm %s6629_s6, 512  ;;  %p5734_p8 = pneg %p5718_p6 }
  0x2b   : > { %p5198_p7 = scmp.ne.s32.totalorder %s6629_s6, %s5197_s24  ;;  %p5204_p11 = scmp.lt.u32.totalorder %s5197_s24, %s6629_s6 }
  0x2d   : > { %p5200_p9 = pnand %p5734_p8, %p5198_p7 }
  0x2f   : > { %p5201_p10 = pneg %p5200_p9 }
  0x31   : > { %p5206_p12 = pnand %p5204_p11, %p5201_p10 }
  0x33   : > { %5209 = shalt.err (!%p5206_p12)
}
  0x34   : > { %s5210_s22 = scalar_lea.vmem %s5707_s2, 512  ;;  %p5218_p5 = scmp.lt.s32.totalorder %s5707_s2, %s5707_s2 }
  0x35   : > { %p5211_p13 = scmp.ne.s32.totalorder %s5707_s2, %s5210_s22  ;;  %p5219_p4 = scmp.lt.s32.totalorder %s5210_s22, %s5210_s22 }
  0x37   : > { %p5213_p0 = pnand %p5211_p13, %p5734_p8  ;;  %p5220_p7 = por %p5219_p4, %p5218_p5 }
  0x39   : > { %p5214_p2 = pneg %p5213_p0 }
  0x3b   : > { %p5221_p9 = pnand %p5220_p7, %p5214_p2 }
  0x3d   : > { %5224 = shalt.err (!%p5221_p9)
}
  0x3e   : > { %s6597_s23 = smov 64   ;;  %s6601_s21 = smov 4  }
  0x3f   : > { %4874 = dma.hbm_to_vmem [thread:$0]  (!%p5718_p6), %s6629_s6, 512, %s5707_s2, [#allocation6], %s6597_s23, %s6597_s23, %s6601_s21  }
  0x40   : > { %s6631_s19 = sld [smem:[#allocation30_spill]] }
  0x46   : > { %s5225_s22 = scalar_lea.hbm %s6631_s19, 512 }
  0x47   : > { %p5226_p4 = scmp.ne.s32.totalorder %s6631_s19, %s5225_s22  ;;  %p5232_p12 = scmp.lt.u32.totalorder %s5225_s22, %s6631_s19 }
  0x49   : > { %p5228_p10 = pnand %p5226_p4, %p5734_p8 }
  0x4b   : > { %p5229_p11 = pneg %p5228_p10 }
  0x4d   : > { %p5234_p13 = pnand %p5232_p12, %p5229_p11 }
  0x4f   : > { %5237 = shalt.err (!%p5234_p13)
}
  0x50   : > { %s5238_s2 = scalar_lea.vmem %s5722_s30, 512  ;;  %p5246_p7 = scmp.lt.s32.totalorder %s5722_s30, %s5722_s30 }
  0x51   : > { %p5239_p0 = scmp.ne.s32.totalorder %s5722_s30, %s5238_s2  ;;  %p5247_p9 = scmp.lt.s32.totalorder %s5238_s2, %s5238_s2 }
  0x53   : > { %p5241_p2 = pnand %p5239_p0, %p5734_p8  ;;  %p5248_p4 = por %p5247_p9, %p5246_p7 }
  0x55   : > { %p5242_p5 = pneg %p5241_p2 }
  0x57   : > { %p5249_p10 = pnand %p5248_p4, %p5242_p5 }
  0x59   : > { %5252 = shalt.err (!%p5249_p10)
}
  0x5a   : > { %4880 = dma.hbm_to_vmem [thread:$0]  (!%p5718_p6), %s6631_s19, 512, %s5722_s30, [#allocation9], %s6597_s23, %s6597_s23, %s6601_s21  }
  0x5b   : > { %s6632_s13 = sld [smem:[#allocation36_spill]] }
  0x61   : > { %s5253_s24 = scalar_lea.hbm %s6632_s13, 256 }
  0x62   : > { %p5254_p11 = scmp.ne.s32.totalorder %s6632_s13, %s5253_s24  ;;  %p5260_p0 = scmp.lt.u32.totalorder %s5253_s24, %s6632_s13 }
  0x64   : > { %p5256_p12 = pnand %p5254_p11, %p5734_p8 }
  0x66   : > { %p5257_p13 = pneg %p5256_p12 }
  0x68   : > { %p5262_p2 = pnand %p5260_p0, %p5257_p13 }
  0x6a   : > { %5265 = shalt.err (!%p5262_p2)
}
  0x6b   : > { %s5266_s30 = scalar_lea.vmem %s5724_s8, 256  ;;  %p5274_p4 = scmp.lt.s32.totalorder %s5724_s8, %s5724_s8 }
  0x6c   : > { %p5267_p5 = scmp.ne.s32.totalorder %s5724_s8, %s5266_s30  ;;  %p5275_p10 = scmp.lt.s32.totalorder %s5266_s30, %s5266_s30 }
  0x6e   : > { %p5269_p7 = pnand %p5267_p5, %p5734_p8  ;;  %p5276_p11 = por %p5275_p10, %p5274_p4 }
  0x70   : > { %p5270_p9 = pneg %p5269_p7 }
  0x72   : > { %p5277_p12 = pnand %p5276_p11, %p5270_p9 }
  0x74   : > { %5280 = shalt.err (!%p5277_p12)
}
  0x75   : > { %4886 = dma.hbm_to_vmem [thread:$0]  (!%p5718_p6), %s6632_s13, 256, %s5724_s8, [#allocation12], %s6597_s23, %s6597_s23, %s6601_s21  }
  0x76   : > { %s5540_s14 = smov [#allocation14]   ;;  %s5541_s16 = smov [#allocation7]  }
  0x77   : > { %s709_s15 = sshll.u32 %s5540_s14, 4  ;;  %s620_s24 = sshll.u32 %s5541_s16, 4  ;;  %s710_s15 = int_to_ptr.vmem [resolvable:$true] %s709_s15  ;;  %s621_s24 = int_to_ptr.vmem [resolvable:$true] %s620_s24 }
  0x78   : > { %s5281_s25 = scalar_lea.hbm %s6578_s18, 1024 }
  0x79   : > { %p5282_p13 = scmp.ne.s32.totalorder %s6578_s18, %s5281_s25  ;;  %p5288_p5 = scmp.lt.u32.totalorder %s5281_s25, %s6578_s18 }
  0x7b   : > { %p5284_p0 = pnand %p5282_p13, %p5734_p8 }
  0x7d   : > { %p5285_p2 = pneg %p5284_p0 }
  0x7f   : > { %p5290_p7 = pnand %p5288_p5, %p5285_p2 }
  0x81   : > { %5293 = shalt.err (!%p5290_p7)
}
  0x82   : > { %s5294_s8 = scalar_lea.vmem %s710_s15, 1024  ;;  %p5302_p11 = scmp.lt.s32.totalorder %s710_s15, %s710_s15 }
  0x83   : > { %p5295_p9 = scmp.ne.s32.totalorder %s710_s15, %s5294_s8  ;;  %p5303_p12 = scmp.lt.s32.totalorder %s5294_s8, %s5294_s8 }
  0x85   : > { %p5297_p4 = pnand %p5295_p9, %p5734_p8  ;;  %p5304_p1 = por %p5303_p12, %p5302_p11 }
  0x87   : > { %p5298_p10 = pneg %p5297_p4 }
  0x89   : > { %p5305_p3 = pnand %p5304_p1, %p5298_p10 }
  0x8b   : > { %5308 = shalt.err (!%p5305_p3)
}
  0x8c   : > { %s6599_s12 = smov 256   ;;  %s6600_s14 = smov 16  }
  0x8d   : > { %4892 = dma.hbm_to_vmem [thread:$0]  (!%p5718_p6), %s6578_s18, 1024, %s710_s15, [#allocation15], %s6599_s12, %s6599_s12, %s6600_s14  }
  0x8e   : > { %s6633_s25 = sld [smem:[#allocation29_spill]] }
  0x94   : > { %s5309_s22 = scalar_lea.hbm %s6633_s25, 512 }
  0x95   : > { %p5310_p1 = scmp.ne.s32.totalorder %s6633_s25, %s5309_s22  ;;  %p5316_p0 = scmp.lt.u32.totalorder %s5309_s22, %s6633_s25 }
  0x97   : > { %p5312_p3 = pnand %p5310_p1, %p5734_p8 }
  0x99   : > { %p5313_p13 = pneg %p5312_p3 }
  0x9b   : > { %p5318_p2 = pnand %p5316_p0, %p5313_p13 }
  0x9d   : > { %5321 = shalt.err (!%p5318_p2)
}
  0x9e   : > { %s5322_s6 = scalar_lea.vmem %s621_s24, 512  ;;  %p5330_p4 = scmp.lt.s32.totalorder %s621_s24, %s621_s24 }
  0x9f   : > { %p5323_p5 = scmp.ne.s32.totalorder %s621_s24, %s5322_s6  ;;  %p5331_p10 = scmp.lt.s32.totalorder %s5322_s6, %s5322_s6 }
  0xa1   : > { %p5325_p7 = pnand %p5323_p5, %p5734_p8  ;;  %p5332_p11 = por %p5331_p10, %p5330_p4 }
  0xa3   : > { %p5326_p9 = pneg %p5325_p7 }
  0xa5   : > { %p5333_p12 = pnand %p5332_p11, %p5326_p9 }
  0xa7   : > { %5336 = shalt.err (!%p5333_p12)
}
  0xa8   : > { %s6634_s15 = smov 64   ;;  %s5544_s4 = smov [#allocation10]  }
  0xa9   : > { %4877 = dma.hbm_to_vmem [thread:$0]  (!%p5718_p6), %s6633_s25, 512, %s621_s24, [#allocation6], %s6634_s15, %s6634_s15, %s6601_s21  }
  0xaa   : > { %s655_s1 = sshll.u32 %s5544_s4, 4  ;;  %s5545_s22 = smov [#allocation13]   ;;  %s656_s1 = int_to_ptr.vmem [resolvable:$true] %s655_s1 }
  0xab   : > { %s696_s30 = sshll.u32 %s5545_s22, 4  ;;  %s6635_s10 = sld [smem:[#allocation34_spill]]  ;;  %s697_s30 = int_to_ptr.vmem [resolvable:$true] %s696_s30 }
  0xb1   : > { %s5337_s6 = scalar_lea.hbm %s6635_s10, 256 }
  0xb2   : > { %p5338_p1 = scmp.ne.s32.totalorder %s6635_s10, %s5337_s6  ;;  %p5344_p0 = scmp.lt.u32.totalorder %s5337_s6, %s6635_s10 }
  0xb4   : > { %p5340_p3 = pnand %p5338_p1, %p5734_p8 }
  0xb6   : > { %p5341_p13 = pneg %p5340_p3 }
  0xb8   : > { %p5346_p2 = pnand %p5344_p0, %p5341_p13 }
  0xba   : > { %5349 = shalt.err (!%p5346_p2)
}
  0xbb   : > { %s5350_s24 = scalar_lea.vmem %s656_s1, 256  ;;  %p5358_p4 = scmp.lt.s32.totalorder %s656_s1, %s656_s1 }
  0xbc   : > { %p5351_p5 = scmp.ne.s32.totalorder %s656_s1, %s5350_s24  ;;  %p5359_p10 = scmp.lt.s32.totalorder %s5350_s24, %s5350_s24 }
  0xbe   : > { %p5353_p7 = pnand %p5351_p5, %p5734_p8  ;;  %p5360_p11 = por %p5359_p10, %p5358_p4 }
  0xc0   : > { %p5354_p9 = pneg %p5353_p7 }
  0xc2   : > { %p5361_p12 = pnand %p5360_p11, %p5354_p9 }
  0xc4   : > { %5364 = shalt.err (!%p5361_p12)
}
  0xc5   : > { %4883 = dma.hbm_to_vmem [thread:$0]  (!%p5718_p6), %s6635_s10, 256, %s656_s1, [#allocation9], %s6634_s15, %s6634_s15, %s6601_s21  }
  0xc6   : > { %s5365_s4 = scalar_lea.hbm %s6577_s17, 2048 }
  0xc7   : > { %p5366_p1 = scmp.ne.s32.totalorder %s6577_s17, %s5365_s4  ;;  %p5372_p0 = scmp.lt.u32.totalorder %s5365_s4, %s6577_s17 }
  0xc9   : > { %p5368_p3 = pnand %p5366_p1, %p5734_p8 }
  0xcb   : > { %p5369_p13 = pneg %p5368_p3 }
  0xcd   : > { %p5374_p2 = pnand %p5372_p0, %p5369_p13 }
  0xcf   : > { %5377 = shalt.err (!%p5374_p2)
}
  0xd0   : > { %s5378_s23 = scalar_lea.vmem %s697_s30, 2048  ;;  %p5386_p4 = scmp.lt.s32.totalorder %s697_s30, %s697_s30 }
  0xd1   : > { %p5379_p5 = scmp.ne.s32.totalorder %s697_s30, %s5378_s23  ;;  %p5387_p10 = scmp.lt.s32.totalorder %s5378_s23, %s5378_s23 }
  0xd3   : > { %p5381_p7 = pnand %p5379_p5, %p5734_p8  ;;  %p5388_p11 = por %p5387_p10, %p5386_p4 }
  0xd5   : > { %p5382_p9 = pneg %p5381_p7 }
  0xd7   : > { %p5389_p12 = pnand %p5388_p11, %p5382_p9 }
  0xd9   : > { %5392 = shalt.err (!%p5389_p12)
}
  0xda   : > { %s6636_s1 = smov 16   ;;  %s6637_s24 = smov 256  }
  0xdb   : > { %4889 = dma.hbm_to_vmem [thread:$0]  (!%p5718_p6), %s6577_s17, 2048, %s697_s30, [#allocation12], %s6637_s24, %s6637_s24, %s6636_s1  }
  0xdc   : > { %s5546_s14 = smov [#allocation16]   ;;  %s5393_s2 = scalar_lea.hbm %s6580_s20, 4096 }
  0xdd   : > { %s725_s16 = sshll.u32 %s5546_s14, 4  ;;  %p5394_p1 = scmp.ne.s32.totalorder %s6580_s20, %s5393_s2  ;;  %s726_s16 = int_to_ptr.vmem [resolvable:$true] %s725_s16 }
  0xde   : > { %p5400_p0 = scmp.lt.u32.totalorder %s5393_s2, %s6580_s20 }
  0xdf   : > { %p5396_p3 = pnand %p5394_p1, %p5734_p8 }
  0xe1   : > { %p5397_p13 = pneg %p5396_p3 }
  0xe3   : > { %p5402_p2 = pnand %p5400_p0, %p5397_p13 }
  0xe5   : > { %5405 = shalt.err (!%p5402_p2)
}
  0xe6   : > { %s5406_s30 = scalar_lea.vmem %s726_s16, 4096  ;;  %p5414_p4 = scmp.lt.s32.totalorder %s726_s16, %s726_s16 }
  0xe7   : > { %p5407_p5 = scmp.ne.s32.totalorder %s726_s16, %s5406_s30  ;;  %p5415_p10 = scmp.lt.s32.totalorder %s5406_s30, %s5406_s30 }
  0xe9   : > { %p5409_p7 = pnand %p5407_p5, %p5734_p8  ;;  %p5416_p11 = por %p5415_p10, %p5414_p4 }
  0xeb   : > { %p5410_p9 = pneg %p5409_p7 }
  0xed   : > { %p5417_p12 = pnand %p5416_p11, %p5410_p9 }
  0xef   : > { %5420 = shalt.err (!%p5417_p12)
}
  0xf0   : > { %s6638_s1 = smov 4   ;;  %s4200_s3 = sadd.s32 4294967294, %s5533_s28  }
  0xf1   : > { %4895 = dma.hbm_to_vmem [thread:$0]  (!%p5718_p6), %s6580_s20, 4096, %s726_s16, [#allocation15], %s6634_s15, %s6634_s15, %s6638_s1  }
  0xf2   : > { %s5917_s7 = sadd.s32 1, %s5533_s28   ;;  %s77_s12 = sadd.s32 1, %s5529_s27 }
  0xf3   : > { %s74_s13 = ssub.s32 %s5533_s28, %s5917_s7  ;;  %p84_p1 = scmp.ne.s32.totalorder %s5529_s27, %s5525_s26 }
  0xf4   : > { %p75_p8 = scmp.eq.s32.totalorder %s74_s13, 0  ;;  %p85_p3 = scmp.eq.s32.totalorder %s5533_s28, 0 }
  0xf5   : > { %p90_p13 = scmp.ne.s32.totalorder %s5525_s26, %s5521_s5  ;;  %p6640_p2 = scmp.eq.s32.totalorder %s5702_s29, 0 }
  0xf6   : > { %s5928_s14 = scalar_select %p75_p8, %s5529_s27, %s77_s12  }
  0xf7   : > { %p5930_p0 = por %p85_p3, %p84_p1  ;;  %p5936_p6 = por %p6640_p2, %p90_p13 }
  0xf8   : > { %p576_p5 = scmp.eq.s32.totalorder %s5702_s29, 1  ;;  %p582_p7 = scmp.eq.s32.totalorder %s4200_s3, 1 }
  0xf9   : > { %p4912_p9 = scmp.lt.s32.totalorder %s5533_s28, 2  ;;  %s757_s16 = sand.u32 1, %s5529_s27  }
  0xfa   : > { %p5943_p4 = por %p576_p5, %p84_p1  ;;  %p5947_p10 = por %p582_p7, %p90_p13 }
  0xfb   : > { %s4211_s8 = sshll.u32 %s757_s16, 5  ;;  %s4413_s6 = sshll.u32 %s5533_s28, 9 }
  0xfc   : > { %s6642_s22 = scalar_select %p5943_p4, 1, 0 }
  0xfd   : > { %s6643_s2 = scalar_select %p5947_p10, 1, 0 }
  0xfe   : > { %s6644_s1 = sld [smem:[#allocation25_spill]]  ;;  %s761_s24 = scalar_lea.vmem [#allocation2], %s4211_s8 }
  0xff   : > { %s768_s3 = sshll.u32 %s761_s24, 4  ;;  %p5961_p11 = pnand %p4912_p9, %p5930_p0  ;;  %s5957_s3 = int_to_ptr.vmem [resolvable:$true] %s768_s3 }
 0x100   : > { %s5965_s12 = scalar_lea.sflag [#allocation3], %s757_s16 }
 0x101   : > { %p5423_p8 = pneg %p5961_p11 }
 0x104   : > { %s5955_s21 = scalar_lea.hbm %s6644_s1, %s4413_s6  ;;  %s5426_s4 = scalar_lea.hbm %s6644_s1, 1024 }
 0x105   : > { %s5421_s23 = scalar_lea.hbm %s5955_s21, 512  ;;  %p5427_p13 = scmp.lt.u32.totalorder %s5955_s21, %s6644_s1 }
 0x106   : > { %p5422_p12 = scmp.ne.s32.totalorder %s5955_s21, %s5421_s23  ;;  %p5428_p0 = scmp.lt.u32.totalorder %s5426_s4, %s5421_s23 }
 0x107   : > { %p5430_p5 = scmp.lt.u32.totalorder %s5421_s23, %s5955_s21 }
 0x108   : > { %p5424_p1 = pnand %p5423_p8, %p5422_p12  ;;  %p5429_p2 = por %p5428_p0, %p5427_p13 }
 0x10a   : > { %p5425_p3 = pneg %p5424_p1  ;;  %p5431_p7 = por %p5430_p5, %p5429_p2 }
 0x10c   : > { %p5432_p9 = pnand %p5431_p7, %p5425_p3 }
 0x10e   : > { %5435 = shalt.err (!%p5432_p9)
}
 0x10f   : > { %s5436_s16 = scalar_lea.vmem %s5957_s3, 512  ;;  %s5547_s8 = smov [#allocation2]  }
 0x110   : > { %p5437_p12 = scmp.ne.s32.totalorder %s5957_s3, %s5436_s16  ;;  %s5441_s6 = sshll.u32 %s5547_s8, 4  ;;  %s5442_s6 = int_to_ptr.vmem [resolvable:$false] %s5441_s6 }
 0x111   : > { %s5443_s30 = scalar_lea.vmem %s5442_s6, 1024  ;;  %p5444_p4 = scmp.lt.s32.totalorder %s5957_s3, %s5442_s6 }
 0x112   : > { %p5439_p1 = pnand %p5437_p12, %p5423_p8  ;;  %p5445_p13 = scmp.lt.s32.totalorder %s5443_s30, %s5436_s16 }
 0x114   : > { %p5440_p10 = pneg %p5439_p1  ;;  %p5446_p0 = por %p5445_p13, %p5444_p4 }
 0x116   : > { %p5447_p2 = pnand %p5446_p0, %p5440_p10 }
 0x118   : > { %5450 = shalt.err (!%p5447_p2)
}
 0x119   : > { %s5548_s23 = smov 128   ;;  %s5549_s4 = smov 8  }
 0x11a   : > { %4899 = dma.hbm_to_vmem [thread:$0]  (!%p5961_p11), %s5955_s21, 512, %s5957_s3, %s5965_s12, %s5548_s23, %s5548_s23, %s5549_s4  }
 0x11b   : > { %p6646_p8 = scmp.ne.s32.totalorder %s6627_s0, 0 }
 0x11c   : > { %s5996_s24 = sand.u32 (!%p6646_p8), 1, %s5525_s26  }
 0x11d   : > { %780 = sbr.rel (%p6646_p8) target bundleno = 4596 (0x11f4), region = 116  ;;  %s6603_s16 = sshll.u32 (!%p6646_p8), %s5996_s24, 5 }
 0x11e   : > { %s783_s8 = scalar_lea.sflag (!%p6646_p8), [#allocation3], %s5996_s24  ;;  %s6002_s6 = scalar_lea.vmem (!%p6646_p8), [#allocation2], %s6603_s16 }
 0x124   : > { %5496 = dma.done.wait (%p5936_p6), %s783_s8, 512  }
 0x125   : > { %5498 = vsyncadd (%p5936_p6), %s783_s8, 4294966784  ;;  %p6647_p4 = scmp.eq.s32.totalorder %s5702_s29, 0 }
 0x127   : > { %5500 = dma.done.wait (%p6647_p4), [#allocation6], 1024   ;;  %p6648_p10 = pmov %p6647_p4 }
 0x128   : > { %p6649_p11 = pmov %p6647_p4 }
 0x129   : > { %5502 = vsyncadd (%p6648_p10), [#allocation6], 4294966272 }
 0x12a   : > { %5504 = dma.done.wait (%p6649_p11), [#allocation9], 768   ;;  %p6650_p3 = pmov %p6647_p4 }
 0x12c   : > { %5506 = vsyncadd (%p6650_p3), [#allocation9], 4294966528  ;;  %p6651_p5 = pmov %p6650_p3 }
 0x12d   : > { %p6652_p7 = pmov %p6650_p3 }
 0x12e   : > { %5508 = dma.done.wait (%p6651_p5), [#allocation12], 2304  }
 0x12f   : > { %5510 = vsyncadd (%p6652_p7), [#allocation12], 4294964992  ;;  %p6653_p6 = pmov %p6650_p3 }
 0x130   : > { %p6654_p9 = pmov %p6650_p3 }
 0x131   : > { %5512 = dma.done.wait (%p6653_p6), [#allocation15], 5120  }
 0x132   : > { %5514 = vsyncadd (%p6654_p9), [#allocation15], 4294962176  ;;  %s4225_s0 = sshll.u32 %s5702_s29, 2  ;;  %s6655_s3 = sld [smem:[#allocation26_spill]]  ;;  %v4982_v16 = vld [vmem:[#allocation7] sm:$0xff]   ;;  %v4984_v18 = vld [vmem:[#allocation7 + $0x8] sm:$0xff]  }
 0x133   : > { %p889_p12 = scmp.lt.s32.totalorder %s4225_s0, 7  ;;  %s6656_s1 = sld [smem:[#allocation24_spill]]  ;;  %v4986_v19 = vld [vmem:[#allocation7 + $0x10] sm:$0xff]   ;;  %v4988_v21 = vld [vmem:[#allocation7 + $0x18] sm:$0xff]   ;;  %v4989_v22 = vld [vmem:[#allocation5] sm:$0xff]   ;;  %vm1050_vm0 = vcmask 523264  }
 0x134   : > { %s6657_s12 = sld [smem:[#allocation27_spill]]  ;;  %v4990_v29 = vld [vmem:[#allocation5 + $0x8] sm:$0xff]   ;;  %v4991_v30 = vld [vmem:[#allocation5 + $0x10] sm:$0xff]   ;;  %v4992_v31 = vld [vmem:[#allocation5 + $0x18] sm:$0xff]   ;;  %v5550_v32 = vmov 0.0   ;;  %vm5551_vm1 = vmmov 0  }
 0x135   : > { %s6679_s0 = smov (!%p889_p12, %s4225_s0), 7  ;;  %vm1520_vm2 = vcmask 1043456   ;;  %vm1464_vm3 = vcmask 64512   ;;  %s6658_s9 = sld [smem:[#allocation33_spill]]  ;;  %vm1977_vm4 = vcmask 261120  }
 0x136   : > { %s4226_s30 = sshll.u32 %s6679_s0, 3  ;;  %s6659_s15 = sld [smem:[#allocation31_spill]] }
 0x137   : > { %s6660_s13 = sld [smem:[#allocation32_spill]]  ;;  %s6663_s16 = sld [smem:[#allocation37_spill]] }
 0x138   : > { %v4973_v0 = vld [vmem:[%s6655_s3] sm:$0xff]   ;;  %v4974_v1 = vld [vmem:[%s6655_s3 + $0x8] sm:$0xff]   ;;  %v4975_v2 = vld [vmem:[%s6655_s3 + $0x10] sm:$0xff]   ;;  %s6664_s4 = sld [smem:[#allocation38_spill]]  ;;  %s6666_s0 = sld [smem:[#allocation41_spill]] }
 0x139   : > { %4571 = vmatprep.subr.bf16.mxu0 %v4973_v0  ;;  %s6037_s10 = scalar_lea.vmem %s6656_s1, %s4226_s30  ;;  %v4976_v3 = vld [vmem:[%s6655_s3 + $0x18] sm:$0xff]   ;;  %v4977_v8 = vld [vmem:[%s6655_s3 + $0x20] sm:$0xff]   ;;  %v4978_v11 = vld [vmem:[%s6655_s3 + $0x28] sm:$0xff]   ;;  %s6662_s30 = sld [smem:[#allocation39_spill]] }
 0x13a   : > { %4572 = vmatpush3.bf16.msra.mxu0 %v4973_v0  ;;  %v897_v4 = vld [vmem:[%s6037_s10] sm:$0xff]  ;;  %v898_v5 = vld [vmem:[%s6037_s10 + $0x8] sm:$0xff]  ;;  %v4985_v10 = vld [vmem:[%s6657_s12 + $0x10] sm:$0xff]   ;;  %s6669_s8 = sshll.u32 %s5996_s24, 5  ;;  %p6671_p13 = scmp.ne.s32.totalorder %s6642_s22, 0 }
 0x13b   : > { %4573 = vmatprep.subr.bf16.mxu0 %v4974_v1  ;;  %v6044_v6 = vpack.c.bf16 %v898_v5, %v897_v4  ;;  %v4981_v7 = vld [vmem:[%s6657_s12] sm:$0xff]   ;;  %v4983_v9 = vld [vmem:[%s6657_s12 + $0x8] sm:$0xff]   ;;  %v4979_v12 = vld [vmem:[%s6655_s3 + $0x30] sm:$0xff]  }
 0x13c   : > { %4591 = vmatprep.subr.bf16.mxu1 %v4981_v7  ;;  %v4980_v13 = vld [vmem:[%s6655_s3 + $0x38] sm:$0xff]   ;;  %v899_v14 = vld [vmem:[%s6037_s10 + $0x10] sm:$0xff]  ;;  %s6665_s3 = sld [smem:[#allocation40_spill]] }
 0x13d   : > { %4587 = vmatprep.mubr.bf16.mxu0 %v6044_v6  ;;  %4592 = vmatpush3.bf16.msra.mxu1 %v4981_v7  ;;  %v900_v15 = vld [vmem:[%s6037_s10 + $0x18] sm:$0xff] }
 0x13e   : > { %4574 = vmatpush3.bf16.msra.mxu0 %v4974_v1  ;;  %4593 = vmatprep.subr.bf16.mxu1 %v4983_v9  ;;  %v6070_v17 = vpack.c.bf16 %v900_v15, %v899_v14  ;;  %v4987_v20 = vld [vmem:[%s6657_s12 + $0x18] sm:$0xff]  }
 0x13f   : > { %4575 = vmatprep.subr.bf16.mxu0 %v4975_v2 }
 0x141   : > { %4594 = vmatpush3.bf16.msra.mxu1 %v4983_v9 }
 0x142   : > { %4576 = vmatpush3.bf16.msra.mxu0 %v4975_v2  ;;  %4595 = vmatprep.subr.bf16.mxu1 %v4985_v10 }
 0x143   : > { %4577 = vmatprep.subr.bf16.mxu0 %v4976_v3 }
 0x145   : > { %4596 = vmatpush3.bf16.msra.mxu1 %v4985_v10 }
 0x146   : > { %4578 = vmatpush3.bf16.msra.mxu0 %v4976_v3  ;;  %4597 = vmatprep.subr.bf16.mxu1 %v4987_v20 }
 0x147   : > { %4579 = vmatprep.subr.bf16.mxu0 %v4977_v8 }
 0x149   : > { %4598 = vmatpush3.bf16.msra.mxu1 %v4987_v20 }
 0x14a   : > { %4580 = vmatpush3.bf16.msra.mxu0 %v4977_v8  ;;  %4603 = vmatprep.subr.bf16.mxu1 %v4989_v22 }
 0x14b   : > { %4581 = vmatprep.subr.bf16.mxu0 %v4978_v11 }
 0x14e   : > { %4582 = vmatpush3.bf16.msra.mxu0 %v4978_v11 }
 0x14f   : > { %4583 = vmatprep.subr.bf16.mxu0 %v4979_v12 }
 0x152   : > { %4584 = vmatpush3.bf16.msra.mxu0 %v4979_v12 }
 0x153   : > { %4585 = vmatprep.subr.bf16.mxu0 %v4980_v13 }
 0x156   : > { %4586 = vmatpush3.bf16.msra.mxu0 %v4980_v13 }
 0x157   : > { %4615 = vmatprep.subr.bf16.mxu0 %v4982_v16 }
 0x159   : > { %4588 = vmatmul.mubr.bf16.vlgmr.msra.gmra.mrb[0].mxu0 %v6070_v17 }
 0x15a   : > { %4616 = vmatpush3.bf16.msra.mxu0 %v4982_v16 }
 0x15b   : > { %4617 = vmatprep.subr.bf16.mxu0 %v4984_v18 }
 0x15e   : > { %4618 = vmatpush3.bf16.msra.mxu0 %v4984_v18 }
 0x15f   : > { %4619 = vmatprep.subr.bf16.mxu0 %v4986_v19 }
 0x162   : > { %4620 = vmatpush3.bf16.msra.mxu0 %v4986_v19 }
 0x163   : > { %4621 = vmatprep.subr.bf16.mxu0 %v4988_v21 }
 0x166   : > { %4622 = vmatpush3.bf16.msra.mxu0 %v4988_v21 }
 0x167   : > { %4639 = vmatprep.subr.bf16.mxu0 %v5550_v32 }
 0x22c   : > { %v6076_v23 = vpop.f32.mrb[0].mxu0 }
 0x22d   : > { %v6078_v24 = vpop.f32.mrb[1].mxu0 }
 0x22e   : > { %v6080_v25 = vpop.f32.mrb[2].mxu0 }
 0x22f   : > { %v1017_v26 = vpack.c.bf16 %v6080_v25, %v6076_v23  ;;  %v6084_v27 = vpop.f32.mrb[3].mxu0 }
 0x230   : > { %v1016_v28 = vpack.c.bf16 %v6084_v27, %v6078_v24 }
 0x232   : > { %4599 = vmatprep.mubr.msk.bf16.mxu1 %vm1050_vm0, %v1016_v28  ;;  %4623 = vmatprep.mubr.msk.bf16.mxu0 %vm1050_vm0, %v1016_v28 }
 0x233   : > { %4600 = vmatmul.mubr.msk.bf16.vlgmr.msra.gmra.mrb[0].mxu1 %vm1050_vm0, %v1017_v26  ;;  %4624 = vmatmul.mubr.msk.bf16.vlgmr.msra.gmra.mrb[4].mxu0 %vm1050_vm0, %v1017_v26 }
 0x234   : > { %4604 = vmatpush3.bf16.msra.mxu1 %v4989_v22  ;;  %4611 = vmatprep.mubr.msk.bf16.mxu1 %vm1050_vm0, %v1016_v28 }
 0x235   : > { %4605 = vmatprep.subr.bf16.mxu1 %v4990_v29  ;;  %4641 = vmatprep.mubr.msk.bf16.mxu0 %vm5551_vm1, %v5550_v32 }
 0x238   : > { %4606 = vmatpush3.bf16.msra.mxu1 %v4990_v29 }
 0x239   : > { %4607 = vmatprep.subr.bf16.mxu1 %v4991_v30 }
 0x23c   : > { %4608 = vmatpush3.bf16.msra.mxu1 %v4991_v30 }
 0x23d   : > { %4609 = vmatprep.subr.bf16.mxu1 %v4992_v31 }
 0x240   : > { %4610 = vmatpush3.bf16.msra.mxu1 %v4992_v31 }
 0x241   : > { %4627 = vmatprep.subr.bf16.mxu1 %v5550_v32 }
 0x243   : > { %4612 = vmatmul.mubr.msk.bf16.vlgmr.msra.gmra.mrb[4].mxu1 %vm1050_vm0, %v1017_v26 }
 0x244   : > { %4629 = vmatprep.mubr.msk.bf16.mxu1 %vm5551_vm1, %v5550_v32 }
 0x306   : > { %v4601_v33 = vpop.f32.mrb[0].mxu1  ;;  %v6100_v34 = vpop.f32.mrb[4].mxu0 }
 0x307   : > { %v1091_v35 = vpop.f32.mrb[1].mxu1  ;;  %v1253_v36 = vpop.f32.mrb[5].mxu0  ;;  %v1270_v51 = vpack.c.bf16 %v4601_v33, %v4601_v33 }
 0x308   : > { %v4602_v37 = vpop.f32.mrb[2].mxu1  ;;  %v6102_v38 = vpop.f32.mrb[6].mxu0  ;;  %v1513_v49 = vpack.c.bf16 %v1253_v36, %v1253_v36  ;;  %v1268_v52 = vpack.c.bf16 %v1091_v35, %v1091_v35 }
 0x309   : > { %v1094_v39 = vpop.f32.mrb[3].mxu1  ;;  %v1256_v40 = vpop.f32.mrb[7].mxu0  ;;  %v1271_v59 = vpack.c.bf16 %v4602_v37, %v4602_v37 }
 0x30a   : > { %v1522_v53 = vsel %vm1520_vm2, %v1513_v49, 0  ;;  %v1269_v56 = vpack.c.bf16 %v1094_v39, %v1094_v39  ;;  %v1514_v58 = vpack.c.bf16 %v1256_v40, %v1256_v40 }
 0x30c   : > { %v1568_v60 = vsel %vm1520_vm2, %v1514_v58, 0 }
 0x316   : > { %v4613_v41 = vpop.f32.mrb[4].mxu1 }
 0x317   : > { %v1274_v42 = vpack.c.bf16 %v4613_v41, %v4613_v41  ;;  %v1172_v43 = vpop.f32.mrb[5].mxu1 }
 0x318   : > { %v1272_v44 = vpack.c.bf16 %v1172_v43, %v1172_v43  ;;  %v4614_v45 = vpop.f32.mrb[6].mxu1 }
 0x319   : > { %v1372_v46 = vsel %vm1050_vm0, %v1274_v42, 0  ;;  %v1175_v47 = vpop.f32.mrb[7].mxu1  ;;  %v1275_v55 = vpack.c.bf16 %v4614_v45, %v4614_v45 }
 0x31a   : > { %v1280_v48 = vsel %vm1050_vm0, %v1272_v44, 0  ;;  %4640 = vmatpush3.bf16.xpose.msra.mxu0 %v1372_v46  ;;  %v1273_v50 = vpack.c.bf16 %v1175_v47, %v1175_v47 }
 0x31b   : > { %4628 = vmatpush3.bf16.xpose.msra.mxu1 %v1280_v48  ;;  %4651 = vmatprep.subr.bf16.mxu0 %v5550_v32  ;;  %v1418_v57 = vsel %vm1050_vm0, %v1275_v55, 0 }
 0x31c   : > { %4633 = vmatprep.subr.bf16.mxu1 %v5550_v32  ;;  %v1326_v54 = vsel %vm1050_vm0, %v1273_v50, 0 }
 0x321   : > { %4642 = vmatmul.mubr.msk.bf16.vlgmr.msra.gmra.mrb[8].mxu0 %vm1050_vm0, %v1270_v51 }
 0x322   : > { %4630 = vmatmul.mubr.msk.bf16.vlgmr.msra.gmra.mrb[8].mxu1 %vm1050_vm0, %v1268_v52  ;;  %4652 = vmatpush3.bf16.msra.mxu0 %v1522_v53 }
 0x323   : > { %4634 = vmatpush3.bf16.xpose.msra.mxu1 %v1326_v54  ;;  %4635 = vmatprep.mubr.msk.bf16.mxu1 %vm5551_vm1, %v5550_v32  ;;  %v1515_v54 = vpack.c.bf16 %v6100_v34, %v6100_v34 }
 0x324   : > { %4645 = vmatprep.subr.bf16.mxu1 %v5550_v32  ;;  %4653 = vmatprep.mubr.msk.bf16.mxu0 %vm5551_vm1, %v5550_v32 }
 0x325   : > { %4663 = vmatprep.subr.bf16.mxu0 %v5550_v32  ;;  %v1614_v58 = vsel %vm1520_vm2, %v1515_v54, 0 }
 0x32a   : > { %4636 = vmatmul.mubr.msk.bf16.vlgmr.msra.gmra.mrb[12].mxu1 %vm1050_vm0, %v1269_v56 }
 0x32b   : > { %4646 = vmatpush3.bf16.xpose.msra.mxu1 %v1418_v57  ;;  %4647 = vmatprep.mubr.msk.bf16.mxu1 %vm5551_vm1, %v5550_v32 }
 0x32c   : > { %4657 = vmatprep.subr.bf16.mxu1 %v5550_v32 }
 0x332   : > { %4648 = vmatmul.mubr.msk.bf16.vlgmr.msra.gmra.mrb[16].mxu1 %vm1050_vm0, %v1271_v59 }
 0x333   : > { %4658 = vmatpush3.bf16.msra.mxu1 %v1568_v60  ;;  %4659 = vmatprep.mubr.msk.bf16.mxu1 %vm5551_vm1, %v5550_v32 }
 0x334   : > { %4669 = vmatprep.subr.bf16.mxu1 %v5550_v32 }
 0x3f4   : > { %v1408_v61 = vpop.f32.mrb[8].mxu0 }
 0x3f5   : > { %v1462_v62 = vmul.f32 0.125, %v1408_v61  ;;  %v1316_v63 = vpop.f32.mrb[8].mxu1  ;;  %v4643_v0 = vpop.f32.mrb[9].mxu0 }
 0x3f6   : > { %v1460_v1 = vmul.f32 0.125, %v1316_v63  ;;  %v4631_v2 = vpop.f32.mrb[9].mxu1  ;;  %v1411_v3 = vpop.f32.mrb[10].mxu0 }
 0x3f7   : > { %v1319_v4 = vpop.f32.mrb[10].mxu1  ;;  %v4644_v5 = vpop.f32.mrb[11].mxu0  ;;  %v1471_v7 = vsel %vm1464_vm3, %v1462_v62, -inf }
 0x3f8   : > { %1472 = vmax.xlane.f32.xlu1 %v1471_v7  ;;  %v4632_v8 = vpop.f32.mrb[11].mxu1  ;;  %v1465_v9 = vsel %vm1464_vm3, %v1460_v1, -inf  ;;  %v4993_v5 = vld [vmem:[#allocation8] sm:$0xff]   ;;  %v4995_v7 = vld [vmem:[#allocation8 + $0x10] sm:$0xff]  }
 0x3f9   : > { %1466 = vmax.xlane.f32.xlu0 %v1465_v9  ;;  %v4996_v8 = vld [vmem:[#allocation8 + $0x18] sm:$0xff]  }
 0x3fd   : > { %v1362_v10 = vpop.f32.mrb[12].mxu1 }
 0x3fe   : > { %v1461_v11 = vmul.f32 0.125, %v1362_v10  ;;  %v4637_v12 = vpop.f32.mrb[13].mxu1 }
 0x3ff   : > { %v1365_v13 = vpop.f32.mrb[14].mxu1 }
 0x400   : > { %v4638_v14 = vpop.f32.mrb[15].mxu1  ;;  %v1468_v15 = vsel %vm1464_vm3, %v1461_v11, -inf }
 0x401   : > { %1469 = vmax.xlane.f32.xlu0 %v1468_v15 }
 0x405   : > { %v1454_v16 = vpop.f32.mrb[16].mxu1 }
 0x406   : > { %v1463_v18 = vmul.f32 0.125, %v1454_v16  ;;  %v4649_v19 = vpop.f32.mrb[17].mxu1 }
 0x407   : > { %v1457_v20 = vpop.f32.mrb[18].mxu1 }
 0x408   : > { %v4650_v21 = vpop.f32.mrb[19].mxu1  ;;  %v1474_v22 = vsel %vm1464_vm3, %v1463_v18, -inf }
 0x409   : > { %1475 = vmax.xlane.f32.xlu1 %v1474_v22 }
 0x485   : > { %v1473_v26 = vpop.xlane.xlu1 %1472 }
 0x486   : > { %v1479_v28 = vsub.f32 %v1462_v62, %v1473_v26  ;;  %v1467_v29 = vpop.xlane.xlu0 %1466  ;;  %v1516_v62 = vpack.c.bf16 %v6102_v38, %v6102_v38  ;;  %v4994_v38 = vld [vmem:[#allocation8 + $0x8] sm:$0xff]  }
 0x487   : > { %v1477_v30 = vsub.f32 %v1460_v1, %v1467_v29 }
 0x488   : > { %v1485_v31 = vmul.f32 1.442695, %v1479_v28  ;;  %v1660_v1 = vsel %vm1520_vm2, %v1516_v62, 0 }
 0x489   : > { %v1481_v33 = vmul.f32 1.442695, %v1477_v30 }
 0x48b   : > { %5137 = vpow2.f32 %v1481_v33 }
 0x48c   : > { %5139 = vpow2.f32 %v1485_v31 }
 0x48e   : > { %v1470_v35 = vpop.xlane.xlu0 %1469 }
 0x48f   : > { %v1478_v36 = vsub.f32 %v1461_v11, %v1470_v35 }
 0x491   : > { %v1483_v37 = vmul.f32 1.442695, %v1478_v36 }
 0x493   : > { %5141 = vpow2.f32 %v1483_v37 }
 0x495   : > { %v5138_v39 = vpop.eup %5137 }
 0x496   : > { %v1476_v40 = vpop.xlane.xlu1 %1475  ;;  %v1489_v41 = vsel %vm1464_vm3, %v5138_v39, 0.0  ;;  %v5140_v42 = vpop.eup %5139 }
 0x497   : > { %v1480_v43 = vsub.f32 %v1463_v18, %v1476_v40  ;;  %1490 = vadd.xlane.f32.xlu0 %v1489_v41  ;;  %v1495_v45 = vsel %vm1464_vm3, %v5140_v42, 0.0 }
 0x499   : > { %v1487_v44 = vmul.f32 1.442695, %v1480_v43 }
 0x49b   : > { %5143 = vpow2.f32 %v1487_v44  ;;  %1496 = vadd.xlane.f32.xlu0 %v1495_v45 }
 0x49d   : > { %v5142_v46 = vpop.eup %5141 }
 0x49e   : > { %v1492_v47 = vsel %vm1464_vm3, %v5142_v46, 0.0 }
 0x49f   : > { %1493 = vadd.xlane.f32.xlu1 %v1492_v47 }
 0x4a5   : > { %v5144_v48 = vpop.eup %5143 }
 0x4a6   : > { %v1498_v49 = vsel %vm1464_vm3, %v5144_v48, 0.0 }
 0x4a7   : > { %1499 = vadd.xlane.f32.xlu1 %v1498_v49 }
 0x524   : > { %v1491_v50 = vpop.xlane.xlu0 %1490 }
 0x525   : > { %5145 = vrcp.f32 %v1491_v50 }
 0x528   : > { %v1497_v51 = vpop.xlane.xlu0 %1496 }
 0x529   : > { %5147 = vrcp.f32 %v1497_v51 }
 0x52c   : > { %v1494_v52 = vpop.xlane.xlu1 %1493 }
 0x52d   : > { %5149 = vrcp.f32 %v1494_v52 }
 0x52f   : > { %v5146_v53 = vpop.eup %5145 }
 0x530   : > { %v1505_v55 = vmul.f32 %v5146_v53, %v5138_v39 }
 0x532   : > { %v1509_v56 = vpack.c.bf16 %v1505_v55, %v1505_v55 }
 0x533   : > { %v5148_v57 = vpop.eup %5147 }
 0x534   : > { %4654 = vmatmul.mubr.msk.bf16.vlgmr.msra.gmra.mrb[12].mxu0 %vm1464_vm3, %v1509_v56  ;;  %v1500_v59 = vpop.xlane.xlu1 %1499  ;;  %v1507_v60 = vmul.f32 %v5148_v57, %v5140_v42 }
 0x535   : > { %4664 = vmatpush3.bf16.msra.mxu0 %v1614_v58  ;;  %5151 = vrcp.f32 %v1500_v59  ;;  %4665 = vmatprep.mubr.msk.bf16.mxu0 %vm5551_vm1, %v5550_v32 }
 0x536   : > { %v1511_v0 = vpack.c.bf16 %v1507_v60, %v1507_v60  ;;  %4675 = vmatprep.subr.bf16.mxu0 %v4993_v5 }
 0x537   : > { %v5150_v61 = vpop.eup %5149 }
 0x538   : > { %v1506_v63 = vmul.f32 %v5150_v61, %v5142_v46 }
 0x53a   : > { %v1510_v34 = vpack.c.bf16 %v1506_v63, %v1506_v63  ;;  %v4997_v63 = vld [vmem:[%s6658_s9] sm:$0xff]  }
 0x53c   : > { %4660 = vmatmul.mubr.msk.bf16.vlgmr.msra.gmra.mrb[20].mxu1 %vm1464_vm3, %v1510_v34  ;;  %4666 = vmatmul.mubr.msk.bf16.vlgmr.msra.gmra.mrb[16].mxu0 %vm1464_vm3, %v1511_v0  ;;  %v4998_v34 = vld [vmem:[%s6658_s9 + $0x8] sm:$0xff]   ;;  %v4999_v0 = vld [vmem:[%s6658_s9 + $0x10] sm:$0xff]  }
 0x53d   : > { %4670 = vmatpush3.bf16.msra.mxu1 %v1660_v1  ;;  %4671 = vmatprep.mubr.msk.bf16.mxu1 %vm5551_vm1, %v5550_v32  ;;  %v5000_v1 = vld [vmem:[%s6658_s9 + $0x18] sm:$0xff]  }
 0x53e   : > { %4676 = vmatpush3.bf16.msra.mxu0 %v4993_v5  ;;  %4687 = vmatprep.subr.bf16.mxu1 %v4997_v63 }
 0x53f   : > { %v5152_v2 = vpop.eup %5151  ;;  %4677 = vmatprep.subr.bf16.mxu0 %v4994_v38 }
 0x540   : > { %v1508_v3 = vmul.f32 %v5152_v2, %v5144_v48  ;;  %v5001_v2 = vld [vmem:[%s6571_s11] sm:$0xff]  }
 0x542   : > { %v1512_v4 = vpack.c.bf16 %v1508_v3, %v1508_v3  ;;  %4678 = vmatpush3.bf16.msra.mxu0 %v4994_v38  ;;  %v5009_v3 = vld [vmem:[#allocation10] sm:$0xff]  }
 0x543   : > { %4679 = vmatprep.subr.bf16.mxu0 %v4995_v7 }
 0x544   : > { %4672 = vmatmul.mubr.msk.bf16.vlgmr.msra.gmra.mrb[24].mxu1 %vm1464_vm3, %v1512_v4 }
 0x545   : > { %4688 = vmatpush3.bf16.msra.mxu1 %v4997_v63 }
 0x546   : > { %4680 = vmatpush3.bf16.msra.mxu0 %v4995_v7  ;;  %4689 = vmatprep.subr.bf16.mxu1 %v4998_v34 }
 0x547   : > { %4681 = vmatprep.subr.bf16.mxu0 %v4996_v8 }
 0x549   : > { %4690 = vmatpush3.bf16.msra.mxu1 %v4998_v34 }
 0x54a   : > { %4682 = vmatpush3.bf16.msra.mxu0 %v4996_v8  ;;  %4691 = vmatprep.subr.bf16.mxu1 %v4999_v0 }
 0x54b   : > { %4699 = vmatprep.subr.bf16.mxu0 %v5009_v3 }
 0x54d   : > { %4692 = vmatpush3.bf16.msra.mxu1 %v4999_v0 }
 0x54e   : > { %4693 = vmatprep.subr.bf16.mxu1 %v5000_v1 }
 0x551   : > { %4694 = vmatpush3.bf16.msra.mxu1 %v5000_v1 }
 0x552   : > { %4707 = vmatprep.subr.bf16.mxu1 %v5001_v2 }
 0x607   : > { %v1558_v9 = vpop.f32.mrb[12].mxu0 }
 0x608   : > { %v4655_v10 = vpop.f32.mrb[13].mxu0 }
 0x609   : > { %v1561_v11 = vpop.f32.mrb[14].mxu0 }
 0x60a   : > { %v4656_v12 = vpop.f32.mrb[15].mxu0 }
 0x60f   : > { %v1604_v13 = vpop.f32.mrb[20].mxu1  ;;  %v1650_v14 = vpop.f32.mrb[16].mxu0 }
 0x610   : > { %v1702_v15 = vpack.c.bf16 %v1604_v13, %v1558_v9  ;;  %v4661_v16 = vpop.f32.mrb[21].mxu1  ;;  %v4667_v18 = vpop.f32.mrb[17].mxu0 }
 0x611   : > { %v1607_v19 = vpop.f32.mrb[22].mxu1  ;;  %v1653_v20 = vpop.f32.mrb[18].mxu0  ;;  %v4267_v18 = vld [vmem:[%s6659_s15] ss:$0 sm:$0xff]  ;;  %s6661_s15 = sld [smem:[#allocation35_spill]] }
 0x612   : > { %v4662_v21 = vpop.f32.mrb[23].mxu1  ;;  %v4668_v22 = vpop.f32.mrb[19].mxu0  ;;  %4683 = vmatprep.mubr.msk.bf16.mxu0 %vm1050_vm0, %v1702_v15 }
 0x617   : > { %v1696_v26 = vpop.f32.mrb[24].mxu1  ;;  %v5014_v63 = vld [vmem:[%s6661_s15 + $0x18] sm:$0xff]   ;;  %v5015_v34 = vld [vmem:[%s6661_s15 + $0x20] sm:$0xff]   ;;  %v5016_v0 = vld [vmem:[%s6661_s15 + $0x28] sm:$0xff]  }
 0x618   : > { %v1703_v28 = vpack.c.bf16 %v1696_v26, %v1650_v14  ;;  %v4673_v29 = vpop.f32.mrb[25].mxu1  ;;  %v5017_v1 = vld [vmem:[%s6661_s15 + $0x30] sm:$0xff]  }
 0x619   : > { %v1699_v30 = vpop.f32.mrb[26].mxu1 }
 0x61a   : > { %v4674_v31 = vpop.f32.mrb[27].mxu1  ;;  %4684 = vmatmul.mubr.msk.bf16.vlgmr.msra.gmra.mrb[20].mxu0 %vm1050_vm0, %v1703_v28  ;;  %v4268_v28 = vld [vmem:[%s6660_s13] ss:$0 sm:$0xff] }
 0x61b   : > { %4700 = vmatpush3.bf16.msra.mxu0 %v5009_v3 }
 0x6ed   : > { %v4685_v33 = vpop.f32.mrb[20].mxu0 }
 0x6ee   : > { %v1793_v35 = vadd.f32 %v4685_v33, %v6076_v23  ;;  %v1776_v36 = vpop.f32.mrb[21].mxu0 }
 0x6ef   : > { %v1791_v37 = vadd.f32 %v1776_v36, %v6078_v24  ;;  %v4686_v39 = vpop.f32.mrb[22].mxu0 }
 0x6f0   : > { %v1794_v40 = vadd.f32 %v4686_v39, %v6080_v25  ;;  %v1779_v41 = vpop.f32.mrb[23].mxu0  ;;  %v1803_v45 = vsel %vm1050_vm0, %v1793_v35, 0.0 }
 0x6f1   : > { %v1792_v42 = vadd.f32 %v1779_v41, %v6084_v27  ;;  %v1797_v43 = vsel %vm1050_vm0, %v1791_v37, 0.0  ;;  %v2033_v41 = vld [vmem:[%s6002_s6] sm:$0xff] }
 0x6f2   : > { %1798 = vadd.xlane.f32.xlu0 %v1797_v43  ;;  %v1806_v23 = vsel %vm1050_vm0, %v1794_v40, 0.0 }
 0x6f3   : > { %v1800_v44 = vsel %vm1050_vm0, %v1792_v42, 0.0 }
 0x6f4   : > { %1801 = vadd.xlane.f32.xlu1 %v1800_v44 }
 0x6f6   : > { %1804 = vadd.xlane.f32.xlu0 %v1803_v45 }
 0x6f8   : > { %1807 = vadd.xlane.f32.xlu1 %v1806_v23 }
 0x77f   : > { %v1799_v46 = vpop.xlane.xlu0 %1798 }
 0x780   : > { %v1810_v24 = vmul.f32 0.015625, %v1799_v46  ;;  %v5002_v46 = vld [vmem:[%s6571_s11 + $0x8] sm:$0xff]  }
 0x781   : > { %v1802_v47 = vpop.xlane.xlu1 %1801 }
 0x782   : > { %v1814_v48 = vsub.f32 %v1791_v37, %v1810_v24  ;;  %v1811_v25 = vmul.f32 0.015625, %v1802_v47  ;;  %v5003_v24 = vld [vmem:[%s6571_s11 + $0x10] sm:$0xff]   ;;  %v5004_v47 = vld [vmem:[%s6571_s11 + $0x18] sm:$0xff]  }
 0x783   : > { %v1805_v49 = vpop.xlane.xlu0 %1804 }
 0x784   : > { %v1815_v50 = vsub.f32 %v1792_v42, %v1811_v25  ;;  %v1812_v27 = vmul.f32 0.015625, %v1805_v49  ;;  %v1818_v51 = vmul.f32 %v1814_v48, %v1814_v48  ;;  %v2034_v42 = vld [vmem:[%s6002_s6 + $0x8] sm:$0xff]  ;;  %v5007_v49 = vld [vmem:[%s6571_s11 + $0x30] sm:$0xff]  }
 0x785   : > { %v1808_v52 = vpop.xlane.xlu1 %1807  ;;  %v2037_v45 = vpack.c.bf16 %v2034_v42, %v2033_v41  ;;  %v5006_v25 = vld [vmem:[%s6571_s11 + $0x28] sm:$0xff]  }
 0x786   : > { %v1816_v53 = vsub.f32 %v1793_v35, %v1812_v27  ;;  %v1813_v54 = vmul.f32 0.015625, %v1808_v52  ;;  %v1822_v55 = vsel %vm1050_vm0, %v1818_v51, 0.0  ;;  %v1819_v56 = vmul.f32 %v1815_v50, %v1815_v50  ;;  %v2035_v27 = vld [vmem:[%s6002_s6 + $0x10] sm:$0xff]  ;;  %v2036_v51 = vld [vmem:[%s6002_s6 + $0x18] sm:$0xff]  ;;  %s887_s6 = scalar_lea.vmem [#allocation17], %s6669_s8 }
 0x787   : > { %1823 = vadd.xlane.f32.xlu0 %v1822_v55  ;;  %v2038_v52 = vpack.c.bf16 %v2036_v51, %v2035_v27  ;;  %s4039_s21 = sshll.u32 %s887_s6, 4  ;;  %s6516_s21 = int_to_ptr.vmem [resolvable:$true] %s4039_s21 }
 0x788   : > { %v1817_v57 = vsub.f32 %v1794_v40, %v1813_v54  ;;  %v1825_v58 = vsel %vm1050_vm0, %v1819_v56, 0.0  ;;  %v1820_v59 = vmul.f32 %v1816_v53, %v1816_v53  ;;  %v5011_v54 = vld [vmem:[%s6661_s15] sm:$0xff]   ;;  %s5451_s1 = scalar_lea.vmem %s6516_s21, 512 }
 0x789   : > { %1826 = vadd.xlane.f32.xlu1 %v1825_v58  ;;  %p5452_p1 = scmp.ne.s32.totalorder %s6516_s21, %s5451_s1 }
 0x78a   : > { %v1828_v60 = vsel %vm1050_vm0, %v1820_v59, 0.0  ;;  %v1821_v61 = vmul.f32 %v1817_v57, %v1817_v57 }
 0x78b   : > { %1829 = vadd.xlane.f32.xlu0 %v1828_v60  ;;  %p5453_p0 = pnand %p5452_p1, %p6671_p13 }
 0x78c   : > { %v1831_v62 = vsel %vm1050_vm0, %v1821_v61, 0.0  ;;  %v5012_v61 = vld [vmem:[%s6661_s15 + $0x8] sm:$0xff]  }
 0x78d   : > { %1832 = vadd.xlane.f32.xlu1 %v1831_v62  ;;  %v5013_v62 = vld [vmem:[%s6661_s15 + $0x10] sm:$0xff]   ;;  %p5454_p2 = pneg %p5453_p0 }
 0x814   : > { %v1824_v4 = vpop.xlane.xlu0 %1823 }
 0x815   : > { %v1834_v5 = vmul.f32 0.015625, %v1824_v4 }
 0x816   : > { %v1827_v38 = vpop.xlane.xlu1 %1826 }
 0x817   : > { %v1838_v7 = vadd.f32 1e-05, %v1834_v5  ;;  %v1835_v8 = vmul.f32 0.015625, %v1827_v38 }
 0x818   : > { %v1830_v9 = vpop.xlane.xlu0 %1829 }
 0x819   : > { %5153 = vrsqrt.f32 %v1838_v7  ;;  %v1839_v10 = vadd.f32 1e-05, %v1835_v8  ;;  %v1836_v11 = vmul.f32 0.015625, %v1830_v9 }
 0x81a   : > { %v1833_v12 = vpop.xlane.xlu1 %1832 }
 0x81b   : > { %5155 = vrsqrt.f32 %v1839_v10  ;;  %v1840_v13 = vadd.f32 1e-05, %v1836_v11  ;;  %v1837_v14 = vmul.f32 0.015625, %v1833_v12 }
 0x81d   : > { %5157 = vrsqrt.f32 %v1840_v13  ;;  %v1841_v15 = vadd.f32 1e-05, %v1837_v14 }
 0x81f   : > { %5159 = vrsqrt.f32 %v1841_v15 }
 0x823   : > { %v5154_v16 = vpop.eup %5153 }
 0x824   : > { %v1846_v19 = vmul.f32 %v5154_v16, %v1814_v48  ;;  %v5005_v48 = vld [vmem:[%s6571_s11 + $0x20] sm:$0xff]  }
 0x825   : > { %v5156_v20 = vpop.eup %5155 }
 0x826   : > { %v1847_v21 = vmul.f32 %v5156_v20, %v1815_v50  ;;  %v1856_v22 = vmul.f32 %v4267_v18, %v1846_v19  ;;  %v5008_v50 = vld [vmem:[%s6571_s11 + $0x38] sm:$0xff]  }
 0x827   : > { %v5158_v26 = vpop.eup %5157 }
 0x828   : > { %v1848_v29 = vmul.f32 %v5158_v26, %v1816_v53  ;;  %v1857_v30 = vmul.f32 %v4267_v18, %v1847_v21  ;;  %v1866_v36 = vadd.f32 %v4268_v28, %v1856_v22  ;;  %v5010_v53 = vld [vmem:[#allocation10 + $0x8] sm:$0xff]  }
 0x829   : > { %v5160_v31 = vpop.eup %5159  ;;  %4701 = vmatprep.subr.bf16.mxu0 %v5010_v53 }
 0x82a   : > { %v1858_v33 = vmul.f32 %v4267_v18, %v1848_v29  ;;  %v1849_v35 = vmul.f32 %v5160_v31, %v1817_v57  ;;  %v1867_v37 = vadd.f32 %v4268_v28, %v1857_v30  ;;  %4702 = vmatpush3.bf16.msra.mxu0 %v5010_v53 }
 0x82b   : > { %4727 = vmatprep.subr.bf16.mxu0 %v5011_v54 }
 0x82c   : > { %v1859_v39 = vmul.f32 %v4267_v18, %v1849_v35  ;;  %v6185_v40 = vpack.c.bf16 %v1867_v37, %v1866_v36  ;;  %v1868_v43 = vadd.f32 %v4268_v28, %v1858_v33 }
 0x82e   : > { %4695 = vmatprep.mubr.msk.bf16.mxu1 %vm1050_vm0, %v6185_v40  ;;  %v1869_v44 = vadd.f32 %v4268_v28, %v1859_v39 }
 0x830   : > { %v6191_v23 = vpack.c.bf16 %v1869_v44, %v1868_v43 }
 0x832   : > { %4696 = vmatmul.mubr.msk.bf16.vlgmr.msra.gmra.mrb[28].mxu1 %vm1050_vm0, %v6191_v23 }
 0x833   : > { %4708 = vmatpush3.bf16.msra.mxu1 %v5001_v2  ;;  %4723 = vmatprep.mubr.bf16.mxu1 %v2037_v45  ;;  %v5018_v2 = vld [vmem:[%s6661_s15 + $0x38] sm:$0xff]  }
 0x834   : > { %4709 = vmatprep.subr.bf16.mxu1 %v5002_v46 }
 0x837   : > { %4710 = vmatpush3.bf16.msra.mxu1 %v5002_v46 }
 0x838   : > { %4711 = vmatprep.subr.bf16.mxu1 %v5003_v24 }
 0x83b   : > { %4712 = vmatpush3.bf16.msra.mxu1 %v5003_v24 }
 0x83c   : > { %4713 = vmatprep.subr.bf16.mxu1 %v5004_v47 }
 0x83f   : > { %4714 = vmatpush3.bf16.msra.mxu1 %v5004_v47 }
 0x840   : > { %4715 = vmatprep.subr.bf16.mxu1 %v5005_v48 }
 0x843   : > { %4716 = vmatpush3.bf16.msra.mxu1 %v5005_v48 }
 0x844   : > { %4717 = vmatprep.subr.bf16.mxu1 %v5006_v25 }
 0x847   : > { %4718 = vmatpush3.bf16.msra.mxu1 %v5006_v25 }
 0x848   : > { %4719 = vmatprep.subr.bf16.mxu1 %v5007_v49 }
 0x84b   : > { %4720 = vmatpush3.bf16.msra.mxu1 %v5007_v49 }
 0x84c   : > { %4721 = vmatprep.subr.bf16.mxu1 %v5008_v50 }
 0x84f   : > { %4722 = vmatpush3.bf16.msra.mxu1 %v5008_v50 }
 0x850   : > { %4747 = vmatprep.subr.bf16.mxu1 %v5550_v32 }
 0x852   : > { %4724 = vmatmul.mubr.bf16.vlgmr.msra.gmra.mrb[32].mxu1 %v2038_v52 }
 0x853   : > { %4749 = vmatprep.mubr.msk.bf16.mxu1 %vm5551_vm1, %v5550_v32 }
 0x905   : > { %v6224_v55 = vpop.f32.mrb[28].mxu1 }
 0x906   : > { %v6226_v56 = vpop.f32.mrb[29].mxu1 }
 0x907   : > { %v6228_v57 = vpop.f32.mrb[30].mxu1 }
 0x908   : > { %v1960_v58 = vpack.c.bf16 %v6228_v57, %v6224_v55  ;;  %v6232_v59 = vpop.f32.mrb[31].mxu1 }
 0x909   : > { %v1959_v60 = vpack.c.bf16 %v6232_v59, %v6226_v56 }
 0x90b   : > { %4703 = vmatprep.mubr.msk.bf16.mxu0 %vm1977_vm4, %v1959_v60 }
 0x90c   : > { %4704 = vmatmul.mubr.msk.bf16.vlgmr.msra.gmra.mrb[24].mxu0 %vm1977_vm4, %v1960_v58 }
 0x90d   : > { %4728 = vmatpush3.bf16.msra.mxu0 %v5011_v54  ;;  %4743 = vmatprep.mubr.bf16.mxu0 %v2037_v45 }
 0x90e   : > { %4729 = vmatprep.subr.bf16.mxu0 %v5012_v61 }
 0x911   : > { %4730 = vmatpush3.bf16.msra.mxu0 %v5012_v61 }
 0x912   : > { %4731 = vmatprep.subr.bf16.mxu0 %v5013_v62 }
 0x915   : > { %4732 = vmatpush3.bf16.msra.mxu0 %v5013_v62 }
 0x916   : > { %4733 = vmatprep.subr.bf16.mxu0 %v5014_v63 }
 0x919   : > { %4734 = vmatpush3.bf16.msra.mxu0 %v5014_v63 }
 0x91a   : > { %4735 = vmatprep.subr.bf16.mxu0 %v5015_v34 }
 0x91d   : > { %4736 = vmatpush3.bf16.msra.mxu0 %v5015_v34 }
 0x91e   : > { %4737 = vmatprep.subr.bf16.mxu0 %v5016_v0 }
 0x921   : > { %4738 = vmatpush3.bf16.msra.mxu0 %v5016_v0 }
 0x922   : > { %4739 = vmatprep.subr.bf16.mxu0 %v5017_v1 }
 0x925   : > { %4740 = vmatpush3.bf16.msra.mxu0 %v5017_v1  ;;  %v4725_v3 = vpop.f32.mrb[32].mxu1 }
 0x926   : > { %4741 = vmatprep.subr.bf16.mxu0 %v5018_v2  ;;  %v2137_v4 = vpop.f32.mrb[33].mxu1  ;;  %v2271_v11 = vpack.c.bf16 %v4725_v3, %v4725_v3 }
 0x927   : > { %v2269_v5 = vpack.c.bf16 %v2137_v4, %v2137_v4  ;;  %v4726_v38 = vpop.f32.mrb[34].mxu1 }
 0x928   : > { %v2140_v7 = vpop.f32.mrb[35].mxu1  ;;  %v2272_v14 = vpack.c.bf16 %v4726_v38, %v4726_v38  ;;  %v2369_v19 = vsel %vm1977_vm4, %v2271_v11, 0 }
 0x929   : > { %4742 = vmatpush3.bf16.msra.mxu0 %v5018_v2  ;;  %v2277_v8 = vsel %vm1977_vm4, %v2269_v5, 0  ;;  %v2270_v9 = vpack.c.bf16 %v2140_v7, %v2140_v7 }
 0x92a   : > { %4753 = vmatprep.subr.bf16.mxu0 %v5550_v32  ;;  %4748 = vmatpush3.bf16.xpose.msra.mxu1 %v2277_v8  ;;  %v2415_v21 = vsel %vm1977_vm4, %v2272_v14, 0 }
 0x92b   : > { %4759 = vmatprep.subr.bf16.mxu1 %v5550_v32  ;;  %v2323_v10 = vsel %vm1977_vm4, %v2270_v9, 0 }
 0x92c   : > { %4744 = vmatmul.mubr.bf16.vlgmr.msra.gmra.mrb[28].mxu0 %v2038_v52 }
 0x92d   : > { %4755 = vmatprep.mubr.msk.bf16.mxu0 %vm5551_vm1, %v5550_v32 }
 0x932   : > { %4754 = vmatpush3.bf16.xpose.msra.mxu0 %v2323_v10 }
 0x933   : > { %4765 = vmatprep.subr.bf16.mxu0 %v5550_v32 }
 0x9df   : > { %v4705_v12 = vpop.f32.mrb[24].mxu0 }
 0x9e0   : > { %v2018_v13 = vpop.f32.mrb[25].mxu0  ;;  %v2267_v22 = vpack.c.bf16 %v4705_v12, %v4705_v12 }
 0x9e1   : > { %v2265_v15 = vpack.c.bf16 %v2018_v13, %v2018_v13  ;;  %v4706_v16 = vpop.f32.mrb[26].mxu0 }
 0x9e2   : > { %v2021_v18 = vpop.f32.mrb[27].mxu0  ;;  %v2268_v26 = vpack.c.bf16 %v4706_v16, %v4706_v16 }
 0x9e3   : > { %v2266_v20 = vpack.c.bf16 %v2021_v18, %v2021_v18  ;;  %4750 = vmatmul.mubr.msk.bf16.vlgmr.msra.gmra.mrb[36].mxu1 %vm1977_vm4, %v2265_v15 }
 0x9e4   : > { %4760 = vmatpush3.bf16.xpose.msra.mxu1 %v2369_v19  ;;  %4761 = vmatprep.mubr.msk.bf16.mxu1 %vm5551_vm1, %v5550_v32 }
 0x9e5   : > { %4756 = vmatmul.mubr.msk.bf16.vlgmr.msra.gmra.mrb[32].mxu0 %vm1977_vm4, %v2266_v20  ;;  %4771 = vmatprep.subr.bf16.mxu1 %v5550_v32 }
 0x9e6   : > { %4766 = vmatpush3.bf16.xpose.msra.mxu0 %v2415_v21  ;;  %4767 = vmatprep.mubr.msk.bf16.mxu0 %vm5551_vm1, %v5550_v32 }
 0x9e7   : > { %4777 = vmatprep.subr.bf16.mxu0 %v5550_v32 }
 0x9eb   : > { %4762 = vmatmul.mubr.msk.bf16.vlgmr.msra.gmra.mrb[40].mxu1 %vm1977_vm4, %v2267_v22 }
 0x9ec   : > { %4773 = vmatprep.mubr.msk.bf16.mxu1 %vm5551_vm1, %v5550_v32 }
 0x9ed   : > { %4768 = vmatmul.mubr.msk.bf16.vlgmr.msra.gmra.mrb[36].mxu0 %vm1977_vm4, %v2268_v26 }
 0x9ee   : > { %4779 = vmatprep.mubr.msk.bf16.mxu0 %vm5551_vm1, %v5550_v32 }
 0x9ff   : > { %v6282_v28 = vpop.f32.mrb[28].mxu0 }
 0xa00   : > { %v2250_v29 = vpop.f32.mrb[29].mxu0 }
 0xa01   : > { %v2509_v30 = vpack.c.bf16 %v2250_v29, %v2250_v29  ;;  %v6284_v31 = vpop.f32.mrb[30].mxu0 }
 0xa02   : > { %v2253_v33 = vpop.f32.mrb[31].mxu0 }
 0xa03   : > { %v2517_v35 = vsel %vm1520_vm2, %v2509_v30, 0  ;;  %v2510_v36 = vpack.c.bf16 %v2253_v33, %v2253_v33  ;;  %v2511_v33 = vpack.c.bf16 %v6282_v28, %v6282_v28 }
 0xa04   : > { %4772 = vmatpush3.bf16.msra.mxu1 %v2517_v35 }
 0xa05   : > { %v2563_v37 = vsel %vm1520_vm2, %v2510_v36, 0  ;;  %4783 = vmatprep.subr.bf16.mxu1 %v5550_v32 }
 0xa06   : > { %4778 = vmatpush3.bf16.msra.mxu0 %v2563_v37  ;;  %v2512_v37 = vpack.c.bf16 %v6284_v31, %v6284_v31 }
 0xa07   : > { %4789 = vmatprep.subr.bf16.mxu0 %v5550_v32 }
 0xab6   : > { %v2313_v39 = vpop.f32.mrb[36].mxu1 }
 0xab7   : > { %v2457_v41 = vmul.f32 0.17677669, %v2313_v39  ;;  %v4751_v42 = vpop.f32.mrb[37].mxu1 }
 0xab8   : > { %v2316_v43 = vpop.f32.mrb[38].mxu1  ;;  %v2359_v44 = vpop.f32.mrb[32].mxu0  ;;  %v2609_v42 = vsel %vm1520_vm2, %v2511_v33, 0 }
 0xab9   : > { %v2458_v45 = vmul.f32 0.17677669, %v2359_v44  ;;  %v4752_v46 = vpop.f32.mrb[39].mxu1  ;;  %v4757_v24 = vpop.f32.mrb[33].mxu0  ;;  %v2461_v47 = vsel %vm1464_vm3, %v2457_v41, -inf }
 0xaba   : > { %2462 = vmax.xlane.f32.xlu0 %v2461_v47  ;;  %v2362_v48 = vpop.f32.mrb[34].mxu0  ;;  %v5021_v44 = vld [vmem:[#allocation13 + $0x4] ss:$16 sps:$4 sm:$0xff]  }
 0xabb   : > { %v4758_v25 = vpop.f32.mrb[35].mxu0  ;;  %v2464_v49 = vsel %vm1464_vm3, %v2458_v45, -inf  ;;  %v5019_v48 = vld [vmem:[#allocation13] ss:$16 sps:$4 sm:$0xff]  }
 0xabc   : > { %2465 = vmax.xlane.f32.xlu1 %v2464_v49  ;;  %v5024_v49 = vld [vmem:[#allocation13 + $0x24] ss:$16 sps:$4 sm:$0xff]  }
 0xabe   : > { %v2405_v50 = vpop.f32.mrb[40].mxu1 }
 0xabf   : > { %v2459_v27 = vmul.f32 0.17677669, %v2405_v50  ;;  %v4763_v51 = vpop.f32.mrb[41].mxu1  ;;  %v5022_v50 = vld [vmem:[#allocation13 + $0x20] ss:$16 sps:$4 sm:$0xff]  }
 0xac0   : > { %v2408_v52 = vpop.f32.mrb[42].mxu1  ;;  %v2451_v53 = vpop.f32.mrb[36].mxu0  ;;  %v5027_v51 = vld [vmem:[#allocation13 + $0x44] ss:$16 sps:$4 sm:$0xff]  }
 0xac1   : > { %v2460_v54 = vmul.f32 0.17677669, %v2451_v53  ;;  %v4764_v58 = vpop.f32.mrb[43].mxu1  ;;  %v4769_v60 = vpop.f32.mrb[37].mxu0  ;;  %v2467_v61 = vsel %vm1464_vm3, %v2459_v27, -inf }
 0xac2   : > { %2468 = vmax.xlane.f32.xlu0 %v2467_v61  ;;  %v2454_v62 = vpop.f32.mrb[38].mxu0  ;;  %v5030_v52 = vld [vmem:[#allocation13 + $0x64] ss:$16 sps:$4 sm:$0xff]   ;;  %v5028_v53 = vld [vmem:[#allocation13 + $0x60] ss:$16 sps:$4 sm:$0xff]   ;;  %v5032_v58 = vld [vmem:[#allocation11 + $0x8] sm:$0xff]  }
 0xac3   : > { %v4770_v63 = vpop.f32.mrb[39].mxu0  ;;  %v2470_v34 = vsel %vm1464_vm3, %v2460_v54, -inf  ;;  %v5035_v60 = vld [vmem:[#allocation13 + $0xc] ss:$16 sps:$4 sm:$0xff]  }
 0xac4   : > { %2471 = vmax.xlane.f32.xlu1 %v2470_v34 }
 0xb47   : > { %v2463_v0 = vpop.xlane.xlu0 %2462 }
 0xb48   : > { %v2473_v1 = vsub.f32 %v2457_v41, %v2463_v0 }
 0xb49   : > { %v2466_v2 = vpop.xlane.xlu1 %2465 }
 0xb4a   : > { %v2477_v3 = vmul.f32 1.442695, %v2473_v1  ;;  %v2474_v4 = vsub.f32 %v2458_v45, %v2466_v2  ;;  %v2655_v45 = vsel %vm1520_vm2, %v2512_v37, 0  ;;  %v5047_v37 = vld [vmem:[%s6662_s30 + $0x4] ss:$16 sps:$4 sm:$0xff]  }
 0xb4c   : > { %5161 = vpow2.f32 %v2477_v3  ;;  %v2479_v5 = vmul.f32 1.442695, %v2474_v4 }
 0xb4e   : > { %5163 = vpow2.f32 %v2479_v5 }
 0xb4f   : > { %v2469_v38 = vpop.xlane.xlu0 %2468 }
 0xb50   : > { %v2475_v7 = vsub.f32 %v2459_v27, %v2469_v38  ;;  %v5552_v27 = vmov 0  }
 0xb51   : > { %v2472_v8 = vpop.xlane.xlu1 %2471 }
 0xb52   : > { %v2481_v9 = vmul.f32 1.442695, %v2475_v7  ;;  %v2476_v10 = vsub.f32 %v2460_v54, %v2472_v8  ;;  %v5031_v54 = vld [vmem:[#allocation11] sm:$0xff]  }
 0xb54   : > { %5165 = vpow2.f32 %v2481_v9  ;;  %v2483_v11 = vmul.f32 1.442695, %v2476_v10  ;;  %v5033_v9 = vld [vmem:[#allocation13 + $0x8] ss:$16 sps:$4 sm:$0xff]  }
 0xb56   : > { %v5162_v12 = vpop.eup %5161  ;;  %5167 = vpow2.f32 %v2483_v11 }
 0xb57   : > { %v2485_v13 = vsel %vm1464_vm3, %v5162_v12, 0.0 }
 0xb58   : > { %v5164_v14 = vpop.eup %5163  ;;  %2486 = vadd.xlane.f32.xlu0 %v2485_v13  ;;  %v5038_v13 = vld [vmem:[#allocation13 + $0x2c] ss:$16 sps:$4 sm:$0xff]  }
 0xb59   : > { %v2488_v15 = vsel %vm1464_vm3, %v5164_v14, 0.0 }
 0xb5a   : > { %2489 = vadd.xlane.f32.xlu1 %v2488_v15 }
 0xb5e   : > { %v5166_v16 = vpop.eup %5165 }
 0xb5f   : > { %v2491_v18 = vsel %vm1464_vm3, %v5166_v16, 0.0 }
 0xb60   : > { %v5168_v19 = vpop.eup %5167  ;;  %2492 = vadd.xlane.f32.xlu0 %v2491_v18  ;;  %v5041_v18 = vld [vmem:[#allocation13 + $0x4c] ss:$16 sps:$4 sm:$0xff]  }
 0xb61   : > { %v2494_v20 = vsel %vm1464_vm3, %v5168_v19, 0.0 }
 0xb62   : > { %2495 = vadd.xlane.f32.xlu1 %v2494_v20  ;;  %v5044_v20 = vld [vmem:[#allocation13 + $0x6c] ss:$16 sps:$4 sm:$0xff]  }
 0xbe5   : > { %v2487_v21 = vpop.xlane.xlu0 %2486 }
 0xbe6   : > { %5169 = vrcp.f32 %v2487_v21  ;;  %v5042_v21 = vld [vmem:[#allocation13 + $0x68] ss:$16 sps:$4 sm:$0xff]  }
 0xbe7   : > { %v2490_v22 = vpop.xlane.xlu1 %2489 }
 0xbe8   : > { %5171 = vrcp.f32 %v2490_v22 }
 0xbed   : > { %v2493_v26 = vpop.xlane.xlu0 %2492 }
 0xbee   : > { %5173 = vrcp.f32 %v2493_v26 }
 0xbef   : > { %v2496_v29 = vpop.xlane.xlu1 %2495 }
 0xbf0   : > { %v5170_v30 = vpop.eup %5169  ;;  %5175 = vrcp.f32 %v2496_v29 }
 0xbf1   : > { %v2501_v35 = vmul.f32 %v5170_v30, %v5162_v12 }
 0xbf2   : > { %v5172_v36 = vpop.eup %5171 }
 0xbf3   : > { %v2502_v39 = vmul.f32 %v5172_v36, %v5164_v14  ;;  %v2505_v41 = vpack.c.bf16 %v2501_v35, %v2501_v35 }
 0xbf5   : > { %4774 = vmatmul.mubr.msk.bf16.vlgmr.msra.gmra.mrb[44].mxu1 %vm1464_vm3, %v2505_v41  ;;  %v2506_v43 = vpack.c.bf16 %v2502_v39, %v2502_v39  ;;  %v5048_v39 = vld [vmem:[%s6662_s30 + $0x8] ss:$16 sps:$4 sm:$0xff]   ;;  %v5050_v41 = vld [vmem:[%s6662_s30 + $0xc] ss:$16 sps:$4 sm:$0xff]  }
 0xbf6   : > { %4784 = vmatpush3.bf16.msra.mxu1 %v2609_v42  ;;  %4785 = vmatprep.mubr.msk.bf16.mxu1 %vm5551_vm1, %v5550_v32  ;;  %v5053_v42 = vld [vmem:[%s6662_s30 + $0x24] ss:$16 sps:$4 sm:$0xff]  }
 0xbf7   : > { %4780 = vmatmul.mubr.msk.bf16.vlgmr.msra.gmra.mrb[40].mxu0 %vm1464_vm3, %v2506_v43  ;;  %4795 = vmatprep.subr.bf16.mxu1 %v5031_v54  ;;  %v5056_v43 = vld [vmem:[%s6662_s30 + $0x2c] ss:$16 sps:$4 sm:$0xff]  }
 0xbf8   : > { %v5174_v28 = vpop.eup %5173  ;;  %4790 = vmatpush3.bf16.msra.mxu0 %v2655_v45  ;;  %4791 = vmatprep.mubr.msk.bf16.mxu0 %vm5551_vm1, %v5550_v32  ;;  %v5025_v32 = vld [vmem:[#allocation13 + $0x40] ss:$16 sps:$4 sm:$0xff]   ;;  %v5054_v45 = vld [vmem:[%s6662_s30 + $0x28] ss:$16 sps:$4 sm:$0xff]  }
 0xbf9   : > { %v2503_v31 = vmul.f32 %v5174_v28, %v5166_v16  ;;  %2977 = vmatprep.subr.bf16.mxu0 %v5021_v44  ;;  %v5036_v16 = vld [vmem:[#allocation13 + $0x28] ss:$16 sps:$4 sm:$0xff]   ;;  %v5051_v44 = vld [vmem:[%s6662_s30 + $0x20] ss:$16 sps:$4 sm:$0xff]   ;;  %v5059_v28 = vld [vmem:[%s6662_s30 + $0x44] ss:$16 sps:$4 sm:$0xff]  }
 0xbfa   : > { %v5176_v46 = vpop.eup %5175 }
 0xbfb   : > { %v2504_v24 = vmul.f32 %v5176_v46, %v5168_v19  ;;  %v2507_v47 = vpack.c.bf16 %v2503_v31, %v2503_v31  ;;  %v5039_v19 = vld [vmem:[#allocation13 + $0x48] ss:$16 sps:$4 sm:$0xff]   ;;  %v5062_v31 = vld [vmem:[%s6662_s30 + $0x4c] ss:$16 sps:$4 sm:$0xff]   ;;  %v5057_v46 = vld [vmem:[%s6662_s30 + $0x40] ss:$16 sps:$4 sm:$0xff]  }
 0xbfd   : > { %4786 = vmatmul.mubr.msk.bf16.vlgmr.msra.gmra.mrb[48].mxu1 %vm1464_vm3, %v2507_v47  ;;  %v2508_v25 = vpack.c.bf16 %v2504_v24, %v2504_v24  ;;  %v5060_v24 = vld [vmem:[%s6662_s30 + $0x48] ss:$16 sps:$4 sm:$0xff]   ;;  %v5065_v47 = vld [vmem:[%s6662_s30 + $0x64] ss:$16 sps:$4 sm:$0xff]  }
 0xbfe   : > { %4796 = vmatpush3.bf16.msra.mxu1 %v5031_v54  ;;  %v5080_v54 = vld [vmem:[%s6662_s30 + $0xac] ss:$16 sps:$4 sm:$0xff]  }
 0xbff   : > { %4792 = vmatmul.mubr.msk.bf16.vlgmr.msra.gmra.mrb[44].mxu0 %vm1464_vm3, %v2508_v25  ;;  %4797 = vmatprep.subr.bf16.mxu1 %v5032_v58  ;;  %v5063_v25 = vld [vmem:[%s6662_s30 + $0x60] ss:$16 sps:$4 sm:$0xff]  }
 0xc00   : > { %2978 = vmatpush1.bf16.msra.mxu0 %v5019_v48  ;;  %3009 = vmatprep.mubr.bf16.mxu0 %v5552_v27  ;;  %v5068_v48 = vld [vmem:[%s6662_s30 + $0x6c] ss:$16 sps:$4 sm:$0xff]  }
 0xc01   : > { %2979 = vmatprep.subr.bf16.mxu0 %v5024_v49  ;;  %v5066_v49 = vld [vmem:[%s6662_s30 + $0x68] ss:$16 sps:$4 sm:$0xff]  }
 0xc02   : > { %4798 = vmatpush3.bf16.msra.mxu1 %v5032_v58  ;;  %v5075_v58 = vld [vmem:[%s6662_s30 + $0xa0] ss:$16 sps:$4 sm:$0xff]  }
 0xc03   : > { %3030 = vmatprep.subr.bf16.mxu1 %v5035_v60  ;;  %v5078_v60 = vld [vmem:[%s6662_s30 + $0xa8] ss:$16 sps:$4 sm:$0xff]  }
 0xc04   : > { %2980 = vmatpush1.bf16.msra.mxu0 %v5022_v50  ;;  %v5071_v50 = vld [vmem:[%s6662_s30 + $0x84] ss:$16 sps:$4 sm:$0xff]  }
 0xc05   : > { %2981 = vmatprep.subr.bf16.mxu0 %v5027_v51  ;;  %v5074_v51 = vld [vmem:[%s6662_s30 + $0x8c] ss:$16 sps:$4 sm:$0xff]  }
 0xc08   : > { %2982 = vmatpush1.bf16.msra.mxu0 %v5025_v32  ;;  %v5069_v32 = vld [vmem:[%s6662_s30 + $0x80] ss:$16 sps:$4 sm:$0xff]  }
 0xc09   : > { %2983 = vmatprep.subr.bf16.mxu0 %v5030_v52  ;;  %v5072_v52 = vld [vmem:[%s6662_s30 + $0x88] ss:$16 sps:$4 sm:$0xff]  }
 0xc0c   : > { %2984 = vmatpush1.bf16.msra.mxu0 %v5028_v53  ;;  %v5077_v53 = vld [vmem:[%s6662_s30 + $0xa4] ss:$16 sps:$4 sm:$0xff]  }
 0xc0d   : > { %3243 = vmatprep.subr.bf16.mxu0 %v5047_v37 }
 0xc0f   : > { %4325 = vmatmul.mubr.msk.bf16.vlgmr.msra.gmra.mrb[48].mxu0 %vm1050_vm0, %v6185_v40 }
 0xc10   : > { %3019 = vmatprep.mubr.bf16.mxu0 %v5552_v27 }
 0xc17   : > { %4326 = vmatmul.mubr.msk.bf16.gmra.mrb[52].mxu0 %vm1050_vm0, %v6191_v23 }
 0xc18   : > { %3275 = vmatprep.mubr.bf16.mxu0 %v5552_v27 }
 0xcc8   : > { %v2553_v61 = vpop.f32.mrb[44].mxu1 }
 0xcc9   : > { %v4775_v62 = vpop.f32.mrb[45].mxu1 }
 0xcca   : > { %v2556_v63 = vpop.f32.mrb[46].mxu1  ;;  %v2599_v34 = vpop.f32.mrb[40].mxu0 }
 0xccb   : > { %v2697_v0 = vpack.c.bf16 %v2599_v34, %v2553_v61  ;;  %v4776_v1 = vpop.f32.mrb[47].mxu1  ;;  %v4781_v2 = vpop.f32.mrb[41].mxu0 }
 0xccc   : > { %v2602_v3 = vpop.f32.mrb[42].mxu0 }
 0xccd   : > { %v4782_v4 = vpop.f32.mrb[43].mxu0  ;;  %4799 = vmatprep.mubr.msk.bf16.mxu1 %vm1977_vm4, %v2697_v0 }
 0xcd0   : > { %v2645_v5 = vpop.f32.mrb[48].mxu1 }
 0xcd1   : > { %v4787_v38 = vpop.f32.mrb[49].mxu1 }
 0xcd2   : > { %v2648_v7 = vpop.f32.mrb[50].mxu1  ;;  %v2691_v8 = vpop.f32.mrb[44].mxu0 }
 0xcd3   : > { %v2698_v10 = vpack.c.bf16 %v2691_v8, %v2645_v5  ;;  %v4788_v11 = vpop.f32.mrb[51].mxu1  ;;  %v4793_v12 = vpop.f32.mrb[45].mxu0 }
 0xcd4   : > { %v2694_v14 = vpop.f32.mrb[46].mxu0 }
 0xcd5   : > { %v4794_v15 = vpop.f32.mrb[47].mxu0  ;;  %4800 = vmatmul.mubr.msk.bf16.vlgmr.msra.gmra.mrb[52].mxu1 %vm1977_vm4, %v2698_v10 }
 0xcd6   : > { %3031 = vmatpush1.bf16.msra.mxu1 %v5033_v9  ;;  %3062 = vmatprep.mubr.bf16.mxu1 %v5552_v27 }
 0xcd7   : > { %3032 = vmatprep.subr.bf16.mxu1 %v5038_v13 }
 0xcda   : > { %3033 = vmatpush1.bf16.msra.mxu1 %v5036_v16  ;;  %v5083_v16 = vld [vmem:[%s6662_s30 + $0xc4] ss:$16 sps:$4 sm:$0xff]  }
 0xcdb   : > { %3034 = vmatprep.subr.bf16.mxu1 %v5041_v18  ;;  %v5086_v18 = vld [vmem:[%s6662_s30 + $0xcc] ss:$16 sps:$4 sm:$0xff]  }
 0xcde   : > { %3035 = vmatpush1.bf16.msra.mxu1 %v5039_v19  ;;  %v5081_v19 = vld [vmem:[%s6662_s30 + $0xc0] ss:$16 sps:$4 sm:$0xff]  }
 0xcdf   : > { %3036 = vmatprep.subr.bf16.mxu1 %v5044_v20  ;;  %v5084_v20 = vld [vmem:[%s6662_s30 + $0xc8] ss:$16 sps:$4 sm:$0xff]  }
 0xce2   : > { %3037 = vmatpush1.bf16.msra.mxu1 %v5042_v21  ;;  %v5089_v21 = vld [vmem:[%s6662_s30 + $0xe4] ss:$16 sps:$4 sm:$0xff]  }
 0xce3   : > { %3296 = vmatprep.subr.bf16.mxu1 %v5050_v41 }
 0xce5   : > { %4327 = vmatmul.mubr.msk.bf16.vlgmr.msra.gmra.mrb[56].mxu1 %vm1050_vm0, %v6185_v40 }
 0xce6   : > { %3072 = vmatprep.mubr.bf16.mxu1 %v5552_v27  ;;  %3297 = vmatpush1.bf16.msra.mxu1 %v5048_v39 }
 0xce7   : > { %3298 = vmatprep.subr.bf16.mxu1 %v5056_v43 }
 0xcea   : > { %3299 = vmatpush1.bf16.msra.mxu1 %v5054_v45 }
 0xceb   : > { %3300 = vmatprep.subr.bf16.mxu1 %v5062_v31 }
 0xced   : > { %4328 = vmatmul.mubr.msk.bf16.gmra.mrb[60].mxu1 %vm1050_vm0, %v6191_v23 }
 0xcee   : > { %3328 = vmatprep.mubr.bf16.mxu1 %v5552_v27  ;;  %3301 = vmatpush1.bf16.msra.mxu1 %v5060_v24 }
 0xcef   : > { %3302 = vmatprep.subr.bf16.mxu1 %v5068_v48 }
 0xcf2   : > { %3303 = vmatpush1.bf16.msra.mxu1 %v5066_v49 }
 0xcf3   : > { %3304 = vmatprep.subr.bf16.mxu1 %v5074_v51 }
 0xcf6   : > { %3305 = vmatpush1.bf16.msra.mxu1 %v5072_v52 }
 0xcf7   : > { %3306 = vmatprep.subr.bf16.mxu1 %v5080_v54 }
 0xcfa   : > { %3307 = vmatpush1.bf16.msra.mxu1 %v5078_v60 }
 0xcfb   : > { %3308 = vmatprep.subr.bf16.mxu1 %v5086_v18  ;;  %v5122_v18 = vld [vmem:[#allocation16 + $0xe0] sm:$0xff]  }
 0xcfe   : > { %3309 = vmatpush1.bf16.msra.mxu1 %v5084_v20  ;;  %v5124_v20 = vld [vmem:[#allocation16 + $0xa0] sm:$0xff]  }
 0xda8   : > { %v4801_v22 = vpop.f32.mrb[52].mxu1 }
 0xda9   : > { %v6329_v26 = vadd.f32 %v4801_v22, %v6224_v55  ;;  %v2755_v29 = vpop.f32.mrb[53].mxu1  ;;  %v5092_v22 = vld [vmem:[%s6662_s30 + $0xec] ss:$16 sps:$4 sm:$0xff]  }
 0xdaa   : > { %v6332_v30 = vadd.f32 %v2755_v29, %v6226_v56  ;;  %v4802_v33 = vpop.f32.mrb[54].mxu1  ;;  %v5090_v29 = vld [vmem:[%s6662_s30 + $0xe8] ss:$16 sps:$4 sm:$0xff]   ;;  %3310 = vmatprep.subr.bf16.mxu1 %v5092_v22 }
 0xdab   : > { %v6335_v35 = vadd.f32 %v4802_v33, %v6228_v57  ;;  %v2758_v40 = vpop.f32.mrb[55].mxu1  ;;  %v2782_v56 = vsel %vm1977_vm4, %v6329_v26, 0.0  ;;  %3311 = vmatpush1.bf16.msra.mxu1 %v5090_v29  ;;  %v5098_v33 = vld [vmem:[#allocation14 + $0xc] ss:$16 sps:$4 sm:$0xff]  }
 0xdac   : > { %v6338_v36 = vadd.f32 %v2758_v40, %v6232_v59  ;;  %v2776_v23 = vsel %vm1977_vm4, %v6332_v30, 0.0  ;;  %v5045_v59 = vld [vmem:[%s6662_s30] ss:$16 sps:$4 sm:$0xff]   ;;  %v5096_v40 = vld [vmem:[#allocation14 + $0x8] ss:$16 sps:$4 sm:$0xff]   ;;  %3458 = vmatprep.subr.bf16.mxu1 %v5098_v33 }
 0xdad   : > { %2777 = vadd.xlane.f32.xlu0 %v2776_v23  ;;  %v2785_v57 = vsel %vm1977_vm4, %v6335_v35, 0.0  ;;  %3244 = vmatpush1.bf16.msra.mxu0 %v5045_v59  ;;  %v5104_v23 = vld [vmem:[#allocation14 + $0x2c] ss:$16 sps:$4 sm:$0xff]   ;;  %v5130_v33 = vld [vmem:[#allocation16 + $0xf0] sm:$0xff]  }
 0xdae   : > { %v2779_v55 = vsel %vm1977_vm4, %v6338_v36, 0.0  ;;  %3245 = vmatprep.subr.bf16.mxu0 %v5053_v42  ;;  %3329 = vmatmul.mubr.bf16.vlgmr.msra.gmra.mrb[56].mxu1 %v6044_v6  ;;  %v5126_v22 = vld [vmem:[#allocation16 + $0xe8] sm:$0xff]  }
 0xdaf   : > { %2780 = vadd.xlane.f32.xlu1 %v2779_v55  ;;  %3338 = vmatprep.mubr.bf16.mxu1 %v5552_v27  ;;  %v5099_v55 = vld [vmem:[#allocation14 + $0x20] ss:$16 sps:$4 sm:$0xff]   ;;  %v5128_v29 = vld [vmem:[#allocation16 + $0xa8] sm:$0xff]  }
 0xdb0   : > { %3459 = vmatpush1.bf16.msra.mxu1 %v5096_v40  ;;  %v5132_v40 = vld [vmem:[#allocation16 + $0xb0] sm:$0xff]  }
 0xdb1   : > { %2783 = vadd.xlane.f32.xlu0 %v2782_v56  ;;  %3246 = vmatpush1.bf16.msra.mxu0 %v5051_v44  ;;  %v5105_v56 = vld [vmem:[#allocation16 + $0x40] sm:$0xff]  }
 0xdb2   : > { %3247 = vmatprep.subr.bf16.mxu0 %v5059_v28  ;;  %3460 = vmatprep.subr.bf16.mxu1 %v5104_v23  ;;  %v5134_v23 = vld [vmem:[#allocation16 + $0xf8] sm:$0xff]  }
 0xdb3   : > { %2786 = vadd.xlane.f32.xlu1 %v2785_v57  ;;  %v5106_v57 = vld [vmem:[#allocation16 + $0xc0] sm:$0xff]  }
 0xdb5   : > { %3248 = vmatpush1.bf16.msra.mxu0 %v5057_v46 }
 0xdb6   : > { %3249 = vmatprep.subr.bf16.mxu0 %v5065_v47  ;;  %3339 = vmatmul.mubr.bf16.gmra.mrb[60].mxu1 %v6070_v17  ;;  %v4307_v47 = vld [vmem:[%s6663_s16] ss:$0 sm:$0xff]  ;;  %s6667_s16 = sld [smem:[#allocation42_spill]] }
 0xdb7   : > { %3490 = vmatprep.mubr.bf16.mxu1 %v5552_v27 }
 0xdb9   : > { %3250 = vmatpush1.bf16.msra.mxu0 %v5063_v25 }
 0xdba   : > { %3251 = vmatprep.subr.bf16.mxu0 %v5071_v50 }
 0xdbd   : > { %3252 = vmatpush1.bf16.msra.mxu0 %v5069_v32  ;;  %v4308_v32 = vld [vmem:[%s6664_s4] ss:$0 sm:$0xff]  ;;  %s6668_s4 = sld [smem:[#allocation43_spill]] }
 0xdbe   : > { %3253 = vmatprep.subr.bf16.mxu0 %v5077_v53 }
 0xdc1   : > { %3254 = vmatpush1.bf16.msra.mxu0 %v5075_v58 }
 0xdc2   : > { %3255 = vmatprep.subr.bf16.mxu0 %v5083_v16  ;;  %v5121_v16 = vld [vmem:[#allocation16 + $0x60] sm:$0xff]  }
 0xdc5   : > { %3256 = vmatpush1.bf16.msra.mxu0 %v5081_v19  ;;  %v5123_v19 = vld [vmem:[#allocation16 + $0x20] sm:$0xff]  }
 0xdc6   : > { %3257 = vmatprep.subr.bf16.mxu0 %v5089_v21  ;;  %v5125_v21 = vld [vmem:[#allocation16 + $0x68] sm:$0xff]  }
 0xe3a   : > { %v2778_v61 = vpop.xlane.xlu0 %2777 }
 0xe3b   : > { %v2789_v62 = vmul.f32 0.03125, %v2778_v61 }
 0xe3c   : > { %v2781_v63 = vpop.xlane.xlu1 %2780 }
 0xe3d   : > { %v6421_v34 = vsub.f32 %v6332_v30, %v2789_v62  ;;  %v2790_v0 = vmul.f32 0.03125, %v2781_v63  ;;  %v5095_v30 = vld [vmem:[#allocation14 + $0x4] ss:$16 sps:$4 sm:$0xff]  }
 0xe3e   : > { %v2784_v1 = vpop.xlane.xlu0 %2783 }
 0xe3f   : > { %v6424_v2 = vsub.f32 %v6338_v36, %v2790_v0  ;;  %v2791_v3 = vmul.f32 0.03125, %v2784_v1  ;;  %v2797_v4 = vmul.f32 %v6421_v34, %v6421_v34  ;;  %v5101_v36 = vld [vmem:[#allocation14 + $0x24] ss:$16 sps:$4 sm:$0xff]   ;;  %v5109_v1 = vld [vmem:[#allocation16 + $0x48] sm:$0xff]  }
 0xe40   : > { %v2787_v5 = vpop.xlane.xlu1 %2786  ;;  %v5108_v0 = vld [vmem:[#allocation16 + $0x80] sm:$0xff]  }
 0xe41   : > { %v6429_v38 = vsub.f32 %v6329_v26, %v2791_v3  ;;  %v2792_v7 = vmul.f32 0.03125, %v2787_v5  ;;  %v2801_v8 = vsel %vm1977_vm4, %v2797_v4, 0.0  ;;  %v2798_v9 = vmul.f32 %v6424_v2, %v6424_v2  ;;  %v5087_v26 = vld [vmem:[%s6662_s30 + $0xe0] ss:$16 sps:$4 sm:$0xff]   ;;  %v5110_v3 = vld [vmem:[#allocation16 + $0xc8] sm:$0xff]  }
 0xe42   : > { %2802 = vadd.xlane.f32.xlu0 %v2801_v8  ;;  %3258 = vmatpush1.bf16.msra.mxu0 %v5087_v26  ;;  %v5111_v5 = vld [vmem:[#allocation16 + $0x8] sm:$0xff]   ;;  %v5114_v8 = vld [vmem:[#allocation16 + $0xd0] sm:$0xff]  }
 0xe43   : > { %v6435_v10 = vsub.f32 %v6335_v35, %v2792_v7  ;;  %v2804_v11 = vsel %vm1977_vm4, %v2798_v9, 0.0  ;;  %v2799_v12 = vmul.f32 %v6429_v38, %v6429_v38  ;;  %v5093_v35 = vld [vmem:[#allocation14] ss:$16 sps:$4 sm:$0xff]   ;;  %3405 = vmatprep.subr.bf16.mxu0 %v5095_v30  ;;  %v5127_v26 = vld [vmem:[#allocation16 + $0x28] sm:$0xff]  }
 0xe44   : > { %2805 = vadd.xlane.f32.xlu1 %v2804_v11  ;;  %v5113_v7 = vld [vmem:[#allocation16 + $0x50] sm:$0xff]  }
 0xe45   : > { %v2807_v13 = vsel %vm1977_vm4, %v2799_v12, 0.0  ;;  %v2800_v14 = vmul.f32 %v6435_v10, %v6435_v10  ;;  %3276 = vmatmul.mubr.bf16.vlgmr.msra.gmra.mrb[48].mxu0 %v6044_v6  ;;  %v5102_v6 = vld [vmem:[#allocation14 + $0x28] ss:$16 sps:$4 sm:$0xff]   ;;  %v5115_v11 = vld [vmem:[#allocation16 + $0x10] sm:$0xff]  }
 0xe46   : > { %2808 = vadd.xlane.f32.xlu0 %v2807_v13  ;;  %3285 = vmatprep.mubr.bf16.mxu0 %v5552_v27  ;;  %v5116_v12 = vld [vmem:[#allocation16 + $0x90] sm:$0xff]   ;;  %v5117_v13 = vld [vmem:[#allocation16 + $0x58] sm:$0xff]  }
 0xe47   : > { %v2810_v15 = vsel %vm1977_vm4, %v2800_v14, 0.0  ;;  %3406 = vmatpush1.bf16.msra.mxu0 %v5093_v35  ;;  %3461 = vmatpush1.bf16.msra.mxu1 %v5102_v6  ;;  %v5118_v14 = vld [vmem:[#allocation16 + $0xd8] sm:$0xff]   ;;  %v5129_v30 = vld [vmem:[#allocation16 + $0x70] sm:$0xff]  }
 0xe48   : > { %2811 = vadd.xlane.f32.xlu1 %v2810_v15  ;;  %3407 = vmatprep.subr.bf16.mxu0 %v5101_v36  ;;  %v5120_v15 = vld [vmem:[#allocation16 + $0x98] sm:$0xff]   ;;  %v5131_v35 = vld [vmem:[#allocation16 + $0x30] sm:$0xff]  }
 0xe49   : > { %4543 = vmatprep.subr.bf16.mxu1 %v5106_v57  ;;  %v5133_v36 = vld [vmem:[#allocation16 + $0x78] sm:$0xff]  }
 0xe4a   : > { %v5136_v6 = vld [vmem:[#allocation16 + $0xb8] sm:$0xff]  }
 0xe4b   : > { %3408 = vmatpush1.bf16.msra.mxu0 %v5099_v55  ;;  %v5135_v55 = vld [vmem:[#allocation16 + $0x38] sm:$0xff]  }
 0xe4c   : > { %4515 = vmatprep.subr.bf16.mxu0 %v5105_v56  ;;  %v3529_v56 = vlaneseq }
 0xe4d   : > { %3286 = vmatmul.mubr.bf16.gmra.mrb[52].mxu0 %v6070_v17 }
 0xe4e   : > { %3437 = vmatprep.mubr.bf16.mxu0 %v5552_v27  ;;  %v3530_v57 = vshrl.u32 %v3529_v56, 7 }
 0xecf   : > { %v2803_v59 = vpop.xlane.xlu0 %2802 }
 0xed0   : > { %v2813_v37 = vmul.f32 0.03125, %v2803_v59  ;;  %v3531_v59 = vsub.s32 0, %v3530_v57 }
 0xed1   : > { %v2806_v39 = vpop.xlane.xlu1 %2805 }
 0xed2   : > { %v2817_v17 = vadd.f32 1e-05, %v2813_v37  ;;  %v2814_v41 = vmul.f32 0.03125, %v2806_v39  ;;  %v3539_v37 = vsub.s32 2, %v3530_v57  ;;  %v3527_v39 = vld [vmem:[%s6665_s3] sm:$0xf] }
 0xed3   : > { %v2809_v42 = vpop.xlane.xlu0 %2808  ;;  %s4414_s3 = sshll.u32 %s5702_s29, 9  ;;  %s5553_s29 = smov [#allocation17]  }
 0xed4   : > { %5177 = vrsqrt.f32 %v2817_v17  ;;  %v2818_v43 = vadd.f32 1e-05, %v2814_v41  ;;  %v2815_v44 = vmul.f32 0.03125, %v2809_v42  ;;  %v3535_v17 = vsub.s32 1, %v3530_v57  ;;  %s5455_s23 = sshll.u32 %s5553_s29, 4  ;;  %s5456_s23 = int_to_ptr.vmem [resolvable:$false] %s5455_s23 }
 0xed5   : > { %v2812_v45 = vpop.xlane.xlu1 %2811  ;;  %v3543_v41 = vsub.s32 3, %v3530_v57  ;;  %v3532_v42 = vrot.slane %v3527_v39, %v3531_v59  ;;  %p5458_p8 = scmp.lt.s32.totalorder %s6516_s21, %s5456_s23 }
 0xed6   : > { %5179 = vrsqrt.f32 %v2818_v43  ;;  %v2819_v28 = vadd.f32 1e-05, %v2815_v44  ;;  %v2816_v31 = vmul.f32 0.03125, %v2812_v45  ;;  %v3540_v43 = vrot.slane %v3527_v39, %v3539_v37 }
 0xed7   : > { %v3536_v44 = vrot.slane %v3527_v39, %v3535_v17  ;;  %v3544_v45 = vrot.slane %v3527_v39, %v3543_v41  ;;  %v4373_v17 = vld [vmem:[%s6666_s0] ss:$0 sm:$0xff] }
 0xed8   : > { %5181 = vrsqrt.f32 %v2819_v28  ;;  %v2820_v46 = vadd.f32 1e-05, %v2816_v31 }
 0xeda   : > { %5183 = vrsqrt.f32 %v2820_v46 }
 0xede   : > { %v5178_v24 = vpop.eup %5177 }
 0xedf   : > { %v2825_v48 = vmul.f32 %v5178_v24, %v6421_v34  ;;  %v5107_v34 = vld [vmem:[#allocation16] sm:$0xff]  }
 0xee0   : > { %v5180_v25 = vpop.eup %5179 }
 0xee1   : > { %v2835_v49 = vmul.f32 %v4307_v47, %v2825_v48  ;;  %v2826_v50 = vmul.f32 %v5180_v25, %v6424_v2 }
 0xee2   : > { %v5182_v51 = vpop.eup %5181 }
 0xee3   : > { %v2836_v52 = vmul.f32 %v4307_v47, %v2826_v50  ;;  %v2845_v54 = vadd.f32 %v4308_v32, %v2835_v49  ;;  %v2827_v60 = vmul.f32 %v5182_v51, %v6429_v38  ;;  %v5112_v38 = vld [vmem:[#allocation16 + $0x88] sm:$0xff]  }
 0xee4   : > { %v5184_v53 = vpop.eup %5183 }
 0xee5   : > { %v2846_v58 = vadd.f32 %v4308_v32, %v2836_v52  ;;  %v2828_v61 = vmul.f32 %v5184_v53, %v6435_v10  ;;  %v2837_v2 = vmul.f32 %v4307_v47, %v2827_v60 }
 0xee7   : > { %v3349_v62 = vpack.c.bf16 %v2846_v58, %v2845_v54  ;;  %v2838_v63 = vmul.f32 %v4307_v47, %v2828_v61  ;;  %v2847_v9 = vadd.f32 %v4308_v32, %v2837_v2 }
 0xee9   : > { %4369 = vmatmul.mubr.msk.bf16.vlgmr.msra.gmra.mrb[48].mxu0 %vm1977_vm4, %v3349_v62  ;;  %4371 = vmatmul.mubr.msk.bf16.vlgmr.msra.gmra.mrb[56].mxu1 %vm1977_vm4, %v3349_v62  ;;  %v2848_v4 = vadd.f32 %v4308_v32, %v2838_v63 }
 0xeea   : > { %3447 = vmatprep.mubr.bf16.mxu0 %v5552_v27  ;;  %3500 = vmatprep.mubr.bf16.mxu1 %v5552_v27  ;;  %v5119_v27 = vld [vmem:[#allocation16 + $0x18] sm:$0xff]  }
 0xeeb   : > { %4516 = vmatpush3.bf16.msra.mxu0 %v5107_v34  ;;  %4544 = vmatpush3.bf16.msra.mxu1 %v5108_v0  ;;  %v3350_v10 = vpack.c.bf16 %v2848_v4, %v2847_v9 }
 0xeec   : > { %4517 = vmatprep.subr.bf16.mxu0 %v5109_v1  ;;  %4545 = vmatprep.subr.bf16.mxu1 %v5110_v3 }
 0xeef   : > { %4518 = vmatpush3.bf16.msra.mxu0 %v5111_v5  ;;  %4546 = vmatpush3.bf16.msra.mxu1 %v5112_v38 }
 0xef0   : > { %4519 = vmatprep.subr.bf16.mxu0 %v5113_v7  ;;  %4547 = vmatprep.subr.bf16.mxu1 %v5114_v8 }
 0xef1   : > { %4370 = vmatmul.mubr.msk.bf16.gmra.mrb[52].mxu0 %vm1977_vm4, %v3350_v10  ;;  %4372 = vmatmul.mubr.msk.bf16.gmra.mrb[60].mxu1 %vm1977_vm4, %v3350_v10 }
 0xef3   : > { %4520 = vmatpush3.bf16.msra.mxu0 %v5115_v11  ;;  %4548 = vmatpush3.bf16.msra.mxu1 %v5116_v12 }
 0xef4   : > { %4521 = vmatprep.subr.bf16.mxu0 %v5117_v13  ;;  %4549 = vmatprep.subr.bf16.mxu1 %v5118_v14 }
 0xef7   : > { %4522 = vmatpush3.bf16.msra.mxu0 %v5119_v27  ;;  %4550 = vmatpush3.bf16.msra.mxu1 %v5120_v15 }
 0xef8   : > { %4523 = vmatprep.subr.bf16.mxu0 %v5121_v16  ;;  %4551 = vmatprep.subr.bf16.mxu1 %v5122_v18 }
 0xefb   : > { %4524 = vmatpush3.bf16.msra.mxu0 %v5123_v19  ;;  %4552 = vmatpush3.bf16.msra.mxu1 %v5124_v20 }
 0xefc   : > { %4525 = vmatprep.subr.bf16.mxu0 %v5125_v21  ;;  %4553 = vmatprep.subr.bf16.mxu1 %v5126_v22 }
 0xeff   : > { %4526 = vmatpush3.bf16.msra.mxu0 %v5127_v26  ;;  %4554 = vmatpush3.bf16.msra.mxu1 %v5128_v29 }
 0xf00   : > { %4527 = vmatprep.subr.bf16.mxu0 %v5129_v30  ;;  %4555 = vmatprep.subr.bf16.mxu1 %v5130_v33 }
 0xf03   : > { %4528 = vmatpush3.bf16.msra.mxu0 %v5131_v35  ;;  %4556 = vmatpush3.bf16.msra.mxu1 %v5132_v40 }
 0xf04   : > { %4529 = vmatprep.subr.bf16.mxu0 %v5133_v36  ;;  %4557 = vmatprep.subr.bf16.mxu1 %v5134_v23 }
 0xf07   : > { %4530 = vmatpush3.bf16.msra.mxu0 %v5135_v55  ;;  %4558 = vmatpush3.bf16.msra.mxu1 %v5136_v6 }
 0xfbc   : > { %v3439_v28 = vpop.f32.mrb[48].mxu0  ;;  %v3492_v31 = vpop.f32.mrb[56].mxu1 }
 0xfbd   : > { %v3549_v46 = vadd.f32 %v3532_v42, %v3439_v28  ;;  %v3551_v24 = vadd.f32 %v3540_v43, %v3492_v31  ;;  %v3441_v47 = vpop.f32.mrb[49].mxu0  ;;  %v3494_v48 = vpop.f32.mrb[57].mxu1 }
 0xfbe   : > { %v3550_v25 = vadd.f32 %v3536_v44, %v3441_v47  ;;  %v3552_v49 = vadd.f32 %v3544_v45, %v3494_v48  ;;  %v3443_v50 = vpop.f32.mrb[50].mxu0  ;;  %v3496_v51 = vpop.f32.mrb[58].mxu1 }
 0xfbf   : > { %v3553_v32 = vadd.f32 %v3532_v42, %v3443_v50  ;;  %v3555_v52 = vadd.f32 %v3540_v43, %v3496_v51  ;;  %v3445_v53 = vpop.f32.mrb[51].mxu0  ;;  %v3498_v54 = vpop.f32.mrb[59].mxu1  ;;  %v3565_v61 = vmax.f32 %v3549_v46, 0.0  ;;  %v3567_v62 = vmax.f32 %v3551_v24, 0.0 }
 0xfc0   : > { %v3554_v58 = vadd.f32 %v3536_v44, %v3445_v53  ;;  %v3556_v60 = vadd.f32 %v3544_v45, %v3498_v54  ;;  %v3566_v0 = vmax.f32 %v3550_v25, 0.0  ;;  %v3568_v1 = vmax.f32 %v3552_v49, 0.0 }
 0xfc1   : > { %v3569_v63 = vmax.f32 %v3553_v32, 0.0  ;;  %v3571_v34 = vmax.f32 %v3555_v52, 0.0  ;;  %v5193_v52 = vld [vmem:[%s6037_s10] sm:$0xff] }
 0xfc2   : > { %v3570_v3 = vmax.f32 %v3554_v58, 0.0  ;;  %v3572_v2 = vmax.f32 %v3556_v60, 0.0 }
 0xfc3   : > { %v3581_v4 = vpack.c.bf16 %v3569_v63, %v3565_v61  ;;  %v3583_v5 = vpack.c.bf16 %v3571_v34, %v3567_v62  ;;  %v5194_v34 = vld [vmem:[%s6037_s10 + $0x8] sm:$0xff] }
 0xfc4   : > { %v3582_v38 = vpack.c.bf16 %v3570_v3, %v3566_v0  ;;  %v3584_v7 = vpack.c.bf16 %v3572_v2, %v3568_v1  ;;  %v3449_v8 = vpop.f32.mrb[52].mxu0  ;;  %v3502_v9 = vpop.f32.mrb[60].mxu1 }
 0xfc5   : > { %v3557_v10 = vadd.f32 %v3532_v42, %v3449_v8  ;;  %v3559_v11 = vadd.f32 %v3540_v43, %v3502_v9  ;;  %v3451_v12 = vpop.f32.mrb[53].mxu0  ;;  %v3504_v13 = vpop.f32.mrb[61].mxu1  ;;  %v5195_v9 = vld [vmem:[%s6037_s10 + $0x10] sm:$0xff] }
 0xfc6   : > { %v3558_v14 = vadd.f32 %v3536_v44, %v3451_v12  ;;  %v3560_v27 = vadd.f32 %v3544_v45, %v3504_v13  ;;  %v3453_v15 = vpop.f32.mrb[54].mxu0  ;;  %v3506_v16 = vpop.f32.mrb[62].mxu1  ;;  %3884 = vmatprep.mubr.bf16.mxu0 %v3582_v38  ;;  %3933 = vmatprep.mubr.bf16.mxu1 %v3584_v7 }
 0xfc7   : > { %v3561_v18 = vadd.f32 %v3532_v42, %v3453_v15  ;;  %v3563_v19 = vadd.f32 %v3540_v43, %v3506_v16  ;;  %v3455_v20 = vpop.f32.mrb[55].mxu0  ;;  %v3508_v21 = vpop.f32.mrb[63].mxu1  ;;  %3885 = vmatmul.mubr.bf16.vlgmr.msra.gmra.mrb[56].mxu0 %v3581_v4  ;;  %3934 = vmatmul.mubr.bf16.vlgmr.msra.gmra.mrb[64].mxu1 %v3583_v5  ;;  %v3573_v29 = vmax.f32 %v3557_v10, 0.0  ;;  %v3575_v30 = vmax.f32 %v3559_v11, 0.0  ;;  %v5196_v11 = vld [vmem:[%s6037_s10 + $0x18] sm:$0xff]  ;;  %s6670_s10 = sld [smem:[#allocation44_spill]] }
 0xfc8   : > { %v3562_v22 = vadd.f32 %v3536_v44, %v3455_v20  ;;  %v3564_v26 = vadd.f32 %v3544_v45, %v3508_v21  ;;  %v3574_v40 = vmax.f32 %v3558_v14, 0.0  ;;  %v3576_v36 = vmax.f32 %v3560_v27, 0.0 }
 0xfc9   : > { %v3577_v33 = vmax.f32 %v3561_v18, 0.0  ;;  %v3579_v35 = vmax.f32 %v3563_v19, 0.0 }
 0xfca   : > { %v3578_v23 = vmax.f32 %v3562_v22, 0.0  ;;  %v3580_v55 = vmax.f32 %v3564_v26, 0.0 }
 0xfcb   : > { %v3585_v6 = vpack.c.bf16 %v3577_v33, %v3573_v29  ;;  %v3587_v56 = vpack.c.bf16 %v3579_v35, %v3575_v30 }
 0xfcc   : > { %v3586_v57 = vpack.c.bf16 %v3578_v23, %v3574_v40  ;;  %v3588_v59 = vpack.c.bf16 %v3580_v55, %v3576_v36 }
 0xfcd   : > { %s6514_s13 = scalar_lea.hbm %s6670_s10, %s4414_s3 }
 0xfce   : > { %3892 = vmatprep.mubr.bf16.mxu0 %v3586_v57  ;;  %3941 = vmatprep.mubr.bf16.mxu1 %v3588_v59 }
 0xfcf   : > { %3893 = vmatmul.mubr.bf16.gmra.mrb[60].mxu0 %v3585_v6  ;;  %3942 = vmatmul.mubr.bf16.gmra.mrb[68].mxu1 %v3587_v56 }
0x109a   : > { %v4531_v37 = vpop.f32.mrb[56].mxu0  ;;  %v4559_v39 = vpop.f32.mrb[64].mxu1 }
0x109b   : > { %v4532_v41 = vpop.f32.mrb[57].mxu0  ;;  %v4560_v42 = vpop.f32.mrb[65].mxu1 }
0x109c   : > { %v4533_v43 = vadd.f32 %v4532_v41, %v4531_v37  ;;  %v4561_v44 = vadd.f32 %v4560_v42, %v4559_v39  ;;  %v4534_v45 = vpop.f32.mrb[58].mxu0  ;;  %v4562_v28 = vpop.f32.mrb[66].mxu1 }
0x109d   : > { %v4535_v31 = vpop.f32.mrb[59].mxu0  ;;  %v4563_v46 = vpop.f32.mrb[67].mxu1 }
0x109e   : > { %v3887_v24 = vadd.f32 %v4533_v43, %v4373_v17  ;;  %v4536_v47 = vadd.f32 %v4535_v31, %v4534_v45  ;;  %v4564_v48 = vadd.f32 %v4563_v46, %v4562_v28  ;;  %v4407_v31 = vld [vmem:[%s6668_s4] ss:$0 sm:$0xff]  ;;  %s5457_s4 = scalar_lea.vmem %s5456_s23, 1024 }
0x109f   : > { %p5459_p4 = scmp.lt.s32.totalorder %s5457_s4, %s5451_s1 }
0x10a0   : > { %v3936_v25 = vadd.f32 %v4561_v44, %v3887_v24  ;;  %v3890_v49 = vadd.f32 %v4536_v47, %v4373_v17  ;;  %v4406_v44 = vld [vmem:[%s6667_s16] ss:$0 sm:$0xff]  ;;  %s4026_s16 = scalar_lea.sflag [#allocation4], %s5996_s24 }
0x10a1   : > { %p5460_p10 = por %p5459_p4, %p5458_p8 }
0x10a2   : > { %v3939_v50 = vadd.f32 %v4564_v48, %v3890_v49  ;;  %v4537_v51 = vpop.f32.mrb[60].mxu0  ;;  %v4565_v32 = vpop.f32.mrb[68].mxu1  ;;  %v3950_v53 = vadd.f32 %v5193_v52, %v3936_v25 }
0x10a3   : > { %v4538_v54 = vpop.f32.mrb[61].mxu0  ;;  %v4566_v58 = vpop.f32.mrb[69].mxu1  ;;  %p5461_p11 = pnand %p5460_p10, %p5454_p2 }
0x10a4   : > { %v4539_v60 = vadd.f32 %v4538_v54, %v4537_v51  ;;  %v4567_v61 = vadd.f32 %v4566_v58, %v4565_v32  ;;  %v4568_v62 = vpop.f32.mrb[70].mxu1  ;;  %3956 = vadd.xlane.f32.xlu0 %v3950_v53  ;;  %v4540_v63 = vpop.f32.mrb[62].mxu0  ;;  %v3951_v0 = vadd.f32 %v5194_v34, %v3939_v50 }
0x10a5   : > { %v4541_v1 = vpop.f32.mrb[63].mxu0  ;;  %v4569_v3 = vpop.f32.mrb[71].mxu1 }
0x10a6   : > { %v3895_v2 = vadd.f32 %v4539_v60, %v4373_v17  ;;  %v4542_v4 = vadd.f32 %v4541_v1, %v4540_v63  ;;  %v4570_v5 = vadd.f32 %v4569_v3, %v4568_v62  ;;  %3958 = vadd.xlane.f32.xlu1 %v3951_v0 }
0x10a8   : > { %v3944_v38 = vadd.f32 %v4567_v61, %v3895_v2  ;;  %v3898_v7 = vadd.f32 %v4542_v4, %v4373_v17 }
0x10aa   : > { %v3947_v8 = vadd.f32 %v4570_v5, %v3898_v7  ;;  %v3952_v10 = vadd.f32 %v5195_v9, %v3944_v38 }
0x10ac   : > { %3960 = vadd.xlane.f32.xlu0 %v3952_v10  ;;  %v3953_v12 = vadd.f32 %v5196_v11, %v3947_v8 }
0x10ae   : > { %3962 = vadd.xlane.f32.xlu1 %v3953_v12 }
0x1131   : > { %v3957_v13 = vpop.xlane.xlu0 %3956 }
0x1132   : > { %v3965_v14 = vmul.f32 0.0078125, %v3957_v13 }
0x1133   : > { %v3959_v27 = vpop.xlane.xlu1 %3958 }
0x1134   : > { %v3969_v15 = vsub.f32 %v3950_v53, %v3965_v14  ;;  %v3966_v16 = vmul.f32 0.0078125, %v3959_v27 }
0x1136   : > { %v3970_v18 = vsub.f32 %v3951_v0, %v3966_v16  ;;  %v3973_v19 = vmul.f32 %v3969_v15, %v3969_v15 }
0x1138   : > { %3977 = vadd.xlane.f32.xlu0 %v3973_v19  ;;  %v3974_v20 = vmul.f32 %v3970_v18, %v3970_v18 }
0x1139   : > { %v3961_v21 = vpop.xlane.xlu0 %3960 }
0x113a   : > { %v3967_v22 = vmul.f32 0.0078125, %v3961_v21  ;;  %3979 = vadd.xlane.f32.xlu1 %v3974_v20 }
0x113b   : > { %v3963_v26 = vpop.xlane.xlu1 %3962 }
0x113c   : > { %v3971_v29 = vsub.f32 %v3952_v10, %v3967_v22  ;;  %v3968_v30 = vmul.f32 0.0078125, %v3963_v26 }
0x113e   : > { %v3972_v33 = vsub.f32 %v3953_v12, %v3968_v30  ;;  %v3975_v35 = vmul.f32 %v3971_v29, %v3971_v29 }
0x1140   : > { %3981 = vadd.xlane.f32.xlu0 %v3975_v35  ;;  %v3976_v40 = vmul.f32 %v3972_v33, %v3972_v33 }
0x1142   : > { %3983 = vadd.xlane.f32.xlu1 %v3976_v40 }
0x11c5   : > { %v3978_v36 = vpop.xlane.xlu0 %3977 }
0x11c6   : > { %v3985_v23 = vmul.f32 0.0078125, %v3978_v36 }
0x11c7   : > { %v3980_v55 = vpop.xlane.xlu1 %3979 }
0x11c8   : > { %v3989_v6 = vadd.f32 1e-05, %v3985_v23  ;;  %v3986_v56 = vmul.f32 0.0078125, %v3980_v55 }
0x11ca   : > { %5185 = vrsqrt.f32 %v3989_v6  ;;  %v3990_v57 = vadd.f32 1e-05, %v3986_v56 }
0x11cc   : > { %5187 = vrsqrt.f32 %v3990_v57 }
0x11cd   : > { %v3982_v59 = vpop.xlane.xlu0 %3981 }
0x11ce   : > { %v3987_v37 = vmul.f32 0.0078125, %v3982_v59 }
0x11cf   : > { %v3984_v39 = vpop.xlane.xlu1 %3983 }
0x11d0   : > { %v3991_v17 = vadd.f32 1e-05, %v3987_v37  ;;  %v3988_v41 = vmul.f32 0.0078125, %v3984_v39 }
0x11d2   : > { %5189 = vrsqrt.f32 %v3991_v17  ;;  %v3992_v42 = vadd.f32 1e-05, %v3988_v41 }
0x11d4   : > { %v5186_v43 = vpop.eup %5185  ;;  %5191 = vrsqrt.f32 %v3992_v42 }
0x11d5   : > { %v3997_v45 = vmul.f32 %v5186_v43, %v3969_v15 }
0x11d6   : > { %v5188_v28 = vpop.eup %5187 }
0x11d7   : > { %v4007_v46 = vmul.f32 %v4406_v44, %v3997_v45  ;;  %v3998_v24 = vmul.f32 %v5188_v28, %v3970_v18 }
0x11d9   : > { %v4017_v47 = vadd.f32 %v4407_v31, %v4007_v46  ;;  %v4008_v48 = vmul.f32 %v4406_v44, %v3998_v24 }
0x11db   : > { %4021 = vst [vmem:[%s887_s6] sm:$0xff] %v4017_v47  ;;  %v4018_v25 = vadd.f32 %v4407_v31, %v4008_v48 }
0x11dc   : > { %v5190_v49 = vpop.eup %5189 }
0x11dd   : > { %4022 = vst [vmem:[%s887_s6 + $0x8] sm:$0xff] %v4018_v25  ;;  %v3999_v50 = vmul.f32 %v5190_v49, %v3971_v29 }
0x11de   : > { %v5192_v51 = vpop.eup %5191 }
0x11df   : > { %v4009_v32 = vmul.f32 %v4406_v44, %v3999_v50  ;;  %v4000_v52 = vmul.f32 %v5192_v51, %v3972_v33 }
0x11e1   : > { %v4019_v53 = vadd.f32 %v4407_v31, %v4009_v32  ;;  %v4010_v54 = vmul.f32 %v4406_v44, %v4000_v52 }
0x11e3   : > { %4023 = vst [vmem:[%s887_s6 + $0x10] sm:$0xff] %v4019_v53  ;;  %v4020_v58 = vadd.f32 %v4407_v31, %v4010_v54 }
0x11e5   : > { %4024 = vst [vmem:[%s887_s6 + $0x18] sm:$0xff] %v4020_v58 }
0x11e6   : > { %5464 = shalt.err (!%p5461_p11)
}
0x11e7   : > { %s5465_s8 = scalar_lea.hbm %s6514_s13, 512  ;;  %s5469_s9 = scalar_lea.hbm %s6670_s10, 1024 }
0x11e8   : > { %p5466_p3 = scmp.ne.s32.totalorder %s6514_s13, %s5465_s8  ;;  %p5470_p6 = scmp.lt.u32.totalorder %s6514_s13, %s6670_s10 }
0x11e9   : > { %p5471_p9 = scmp.lt.u32.totalorder %s5469_s9, %s5465_s8  ;;  %p5473_p1 = scmp.lt.u32.totalorder %s5465_s8, %s6514_s13 }
0x11ea   : > { %p5467_p5 = pnand %p5466_p3, %p6671_p13 }
0x11eb   : > { %p5472_p12 = por %p5471_p9, %p5470_p6 }
0x11ec   : > { %p5468_p7 = pneg %p5467_p5 }
0x11ed   : > { %p5474_p0 = por %p5473_p1, %p5472_p12 }
0x11ef   : > { %p5475_p2 = pnand %p5474_p0, %p5468_p7 }
0x11f1   : > { %5478 = shalt.err (!%p5475_p2)
}
0x11f2   : > { %s5554_s1 = smov 128   ;;  %s5555_s23 = smov 8  }
0x11f3   : > { %4869 = dma.vmem_to_hbm [thread:$0]  (%p6671_p13), %s6516_s21, 512, %s6514_s13, %s4026_s16, %s5554_s1, %s5554_s1, %s5555_s23  }
0x11f4 PF: > { %s4054_s4 = sand.u32 1, %s5521_s5   ;;  %p6672_p8 = scmp.ne.s32.totalorder %s6643_s2, 0 }
0x11f5   : > { %p6673_p4 = scmp.ge.s32.totalorder %s5533_s28, 2  ;;  %s4055_s8 = scalar_lea.sflag [#allocation4], %s4054_s4 }
0x11f7   : > { %p4901_p10 = pnand %p6673_p4, %p6672_p8 }
0x11f9   : > { %5516 = dma.done.wait (!%p4901_p10), %s4055_s8, 512  }
0x11fa   : > { %5518 = vsyncadd (!%p4901_p10), %s4055_s8, 4294966784  ;;  %p41_p11 = scmp.ge.s32.totalorder %s5917_s7, 4   ;;  %s6674_s5 = smov %s5525_s26 }
0x11fb   : > { %s6675_s26 = smov %s5529_s27  ;;  %s6676_s27 = smov %s5928_s14 }
0x11fc   : > { %s6677_s28 = smov %s5917_s7  ;;  %43 = sbr.rel (!%p41_p11) target bundleno = 31 (0x1f), region = 196 }
0x1203   :  { %4060 = vsyncpa [#allocation3], 1 }
0x1204   :  { %4062 = vsyncpa [#allocation3 + $0x1], 1 }
0x1205   :  { %4063 = vsyncpa [#allocation6], 1 }
0x1206   :  { %4064 = vsyncpa [#allocation9], 1 }
0x1207   :  { %4065 = vsyncpa [#allocation12], 1 }
0x1208   :  { %4066 = vsyncpa [#allocation15], 1 }
0x1209   :  { %4067 = vsyncpa [#allocation4], 1 }
0x120a   :  { %4069 = vsyncpa [#allocation4 + $0x1], 1 }

</bundles_post_ra>
